<compile_context>
chip_gen: v5e
topology: v5e:2x2
jax: 0.10.0
libtpu: 0.0.40
codegen_flags: <defaults>
</compile_context>

<pallas_src>
import math
from functools import partial

import jax
import jax.numpy as jnp
from jax.experimental import pallas as pl
from jax.experimental.pallas import tpu as pltpu


LANE = 128  # pad final per-branch output width (and obs) to full lane tiles


def _round_up(x, m):
    return -(-x // m) * m


# ----------------------------------------------------------------------------
# Pallas kernel: fused chained Linear (+ReLU except on the final layer).
# x tile is (TB, OBS_PAD) bf16; weights are bf16, biases f32, whole-array
# VMEM-resident blocks. MXU matmuls accumulate in f32.
# ----------------------------------------------------------------------------
def _fused_mlp_kernel(*refs, num_layers):
    # refs = (x_ref, w0, b0, w1, b1, ..., w{L-1}, b{L-1}, out_ref)
    x_ref = refs[0]
    out_ref = refs[-1]
    param_refs = refs[1:-1]

    h = x_ref[...]                                  # bf16 activations
    for i in range(num_layers):
        w = param_refs[2 * i][...]                  # bf16 (in, out)
        b = param_refs[2 * i + 1][...]              # f32  (1, out) broadcast add
        acc = jnp.dot(h, w, preferred_element_type=jnp.float32) + b
        if i < num_layers - 1:
            h = jnp.maximum(acc, 0.0).astype(jnp.bfloat16)   # ReLU, back to bf16
        else:
            h = acc                                 # final layer stays f32
    out_ref[...] = h.astype(out_ref.dtype)


# ----------------------------------------------------------------------------
# Batch tiling: >= 2 grid steps whenever possible (v7x megacore), tile <= 1024.
# ----------------------------------------------------------------------------
def _choose_batch_tile(B, max_tile=1024):
    b8 = _round_up(B, 8)
    if b8 <= 8:
        return b8, b8                      # single step; overhead-bound anyway
    tb = min(max_tile, _round_up(-(-b8 // 2), 8))
    b_pad = _round_up(b8, tb)
    return tb, b_pad


def _run_fused(x_pad, flat_params, num_layers, tb, b_pad, obs_pad, out_width,
               single_buffer_weights):
    if single_buffer_weights:
        def w_spec(shape):
            return pl.BlockSpec(shape, lambda i: (0, 0),
                                pipeline_mode=pl.Buffered(1))
    else:
        def w_spec(shape):
            return pl.BlockSpec(shape, lambda i: (0, 0))

    in_specs = [pl.BlockSpec((tb, obs_pad), lambda i: (i, 0))]   # x: batch-tiled
    in_specs += [w_spec(p.shape) for p in flat_params]           # weights resident

    return pl.pallas_call(
        partial(_fused_mlp_kernel, num_layers=num_layers),
        out_shape=jax.ShapeDtypeStruct((b_pad, out_width), jnp.float32),
        grid=(b_pad // tb,),
        in_specs=in_specs,
        out_specs=pl.BlockSpec((tb, out_width), lambda i: (i, 0)),
        compiler_params=pltpu.CompilerParams(
            dimension_semantics=("parallel",)),
    )(x_pad, *flat_params)


# ----------------------------------------------------------------------------
# Single fused launch: computes BOTH branches from one x DMA.
# ----------------------------------------------------------------------------
def acer_fused_forward(packed, x):
    """x: (B, obs) f32. Returns (B, 2*a_pad) f32: [:, :a_pad]=actor, [:, a_pad:]=critic."""
    layers = packed["layers"]
    num_layers = len(layers)
    out_width = layers[-1][0].shape[1]      # 2 * a_pad
    obs_pad = packed["obs_pad"]

    B, obs = x.shape
    tb, b_pad = _choose_batch_tile(B)
    # pad batch to the tile and obs to a lane-dense width; feed the MXU in bf16
    x_pad = jnp.pad(x, ((0, b_pad - B), (0, obs_pad - obs))).astype(jnp.bfloat16)

    flat_params = [p for wb in layers for p in wb]

    try:
        out = _run_fused(x_pad, flat_params, num_layers, tb, b_pad, obs_pad,
                         out_width, single_buffer_weights=True)
    except Exception:
        # fallback if this Pallas build rejects pl.Buffered(1) on inputs
        out = _run_fused(x_pad, flat_params, num_layers, tb, b_pad, obs_pad,
                         out_width, single_buffer_weights=False)
    return out[:B]


def acer_forward_both(packed, x):
    """One kernel launch -> both heads."""
    out = acer_fused_forward(packed, x)
    a = packed["action_dim"]
    a_pad = packed["a_pad"]
    return {"logit": out[:, :a], "q_value": out[:, a_pad:a_pad + a]}


def acer_forward(packed, inputs, mode):
    """Mirrors the PyTorch module API (mode dispatch)."""
    assert mode in ("compute_actor", "compute_critic")
    both = acer_forward_both(packed, inputs)
    if mode == "compute_actor":
        return {"logit": both["logit"]}
    return {"q_value": both["q_value"]}


# ----------------------------------------------------------------------------
# Parameter construction (deterministic, PyTorch nn.Linear default init) and
# block-diagonal fused packing (weights stored bf16, biases f32).
# ----------------------------------------------------------------------------
def _init_linear(key, in_f, out_f):
    kw, kb = jax.random.split(key)
    bound = 1.0 / math.sqrt(in_f)
    w = jax.random.uniform(kw, (in_f, out_f), jnp.float32, -bound, bound)
    b = jax.random.uniform(kb, (1, out_f), jnp.float32, -bound, bound)
    return w, b


def init_acer_params(key, obs_shape, action_shape,
                     encoder_hidden_size_list=(128, 128, 64),
                     actor_head_hidden_size=64, critic_head_hidden_size=64):
    dims_enc = [obs_shape] + list(encoder_hidden_size_list)

    def make_branch(key, head_hidden):
        keys = jax.random.split(key, len(dims_enc) - 1 + 2)
        layers = []
        # FCEncoder: Linear+ReLU chain over encoder_hidden_size_list
        for i in range(len(dims_enc) - 1):
            layers.append(_init_linear(keys[i], dims_enc[i], dims_enc[i + 1]))
        # Head: MLP(hidden, hidden, layer_num=1)+ReLU, then final Linear(hidden, A)
        layers.append(_init_linear(keys[-2], head_hidden, head_hidden))
        layers.append(_init_linear(keys[-1], head_hidden, action_shape))
        return layers

    k_actor, k_critic = jax.random.split(key)
    return {
        "actor": make_branch(k_actor, actor_head_hidden_size),
        "critic": make_branch(k_critic, critic_head_hidden_size),
    }


def pack_acer_params(params, obs_shape, action_shape):
    """Pack actor+critic per-layer weights into fused block-diagonal bf16 layers.

    Layer 0 shares the input x:        W = [W_a0 | W_c0]  (obs_pad, 256), zero row pad
    Middle layers are block-diagonal:  W = diag(W_a, W_c)
    Final layer is zero-padded to LANE columns per branch (lane-dense output).
    Weights -> bf16 (MXU-native); biases stay f32 (added onto the f32 accumulator).
    """
    actor, critic = params["actor"], params["critic"]
    a_pad = _round_up(action_shape, LANE)
    obs_pad = _round_up(obs_shape, LANE)
    n = len(actor)
    packed_layers = []
    for li in range(n):
        wa, ba = actor[li]
        wc, bc = critic[li]
        if li == n - 1:  # pad final out-features to a full lane tile per branch
            wa = jnp.pad(wa, ((0, 0), (0, a_pad - wa.shape[1])))
            wc = jnp.pad(wc, ((0, 0), (0, a_pad - wc.shape[1])))
            ba = jnp.pad(ba, ((0, 0), (0, a_pad - ba.shape[1])))
            bc = jnp.pad(bc, ((0, 0), (0, a_pad - bc.shape[1])))
        if li == 0:
            # shared input row-space; pad obs rows to a lane-dense contraction
            wa = jnp.pad(wa, ((0, obs_pad - wa.shape[0]), (0, 0)))
            wc = jnp.pad(wc, ((0, obs_pad - wc.shape[0]), (0, 0)))
            w = jnp.concatenate([wa, wc], axis=1)
        else:
            ia, oa = wa.shape
            ic, oc = wc.shape
            w = jnp.block([[wa, jnp.zeros((ia, oc), jnp.float32)],
                           [jnp.zeros((ic, oa), jnp.float32), wc]])
        b = jnp.concatenate([ba, bc], axis=1)
        packed_layers.append((w.astype(jnp.bfloat16), b.astype(jnp.float32)))
    return {"layers": packed_layers, "action_dim": action_shape,
            "a_pad": a_pad, "obs_pad": obs_pad}


# ----------------------------------------------------------------------------
# Pure-JAX references (unfused, per-branch) for sanity checking the kernel.
# ----------------------------------------------------------------------------
def _ref_mlp_chain_f32(x, layers):
    h = x.astype(jnp.float32)
    for i, (w, b) in enumerate(layers):
        h = h @ w + b
        if i < len(layers) - 1:
            h = jnp.maximum(h, 0.0)
    return h


def _ref_mlp_chain_bf16(x, layers):
    """Emulates the kernel numerics: bf16 operands, f32 accumulation + bias."""
    h = x.astype(jnp.bfloat16)
    for i, (w, b) in enumerate(layers):
        acc = jnp.dot(h, w.astype(jnp.bfloat16),
                      preferred_element_type=jnp.float32) + b
        if i < len(layers) - 1:
            h = jnp.maximum(acc, 0.0).astype(jnp.bfloat16)
        else:
            h = acc
    return h


if __name__ == "__main__":
    B = 4
    OBS = 16
    ACT = 6

    key = jax.random.PRNGKey(0)
    k_param, k_in = jax.random.split(key)
    raw_params = init_acer_params(k_param, OBS, ACT)
    packed = pack_acer_params(raw_params, OBS, ACT)
    x = jax.random.normal(k_in, (B, OBS), jnp.float32)

    # single fused launch computing both heads
    both = acer_forward_both(packed, x)
    logit = jax.block_until_ready(both["logit"])
    q_value = jax.block_until_ready(both["q_value"])

    # mode-dispatch API (same fused kernel underneath)
    logit2 = jax.block_until_ready(acer_forward(packed, x, "compute_actor")["logit"])
    q2 = jax.block_until_ready(acer_forward(packed, x, "compute_critic")["q_value"])

    assert logit.shape == (B, ACT)
    assert q_value.shape == (B, ACT)

    # tight check against a bf16-emulating per-branch reference (same numerics)
    logit_ref_bf16 = _ref_mlp_chain_bf16(x, raw_params["actor"])
    q_ref_bf16 = _ref_mlp_chain_bf16(x, raw_params["critic"])
    assert jnp.allclose(logit, logit_ref_bf16, atol=2e-3, rtol=1e-2)
    assert jnp.allclose(q_value, q_ref_bf16, atol=2e-3, rtol=1e-2)
    assert jnp.allclose(logit2, logit_ref_bf16, atol=2e-3, rtol=1e-2)
    assert jnp.allclose(q2, q_ref_bf16, atol=2e-3, rtol=1e-2)

    # loose check against the pure-f32 reference (bf16 weight rounding error)
    logit_ref_f32 = _ref_mlp_chain_f32(x, raw_params["actor"])
    q_ref_f32 = _ref_mlp_chain_f32(x, raw_params["critic"])
    assert jnp.allclose(logit, logit_ref_f32, atol=5e-2, rtol=5e-2)
    assert jnp.allclose(q_value, q_ref_f32, atol=5e-2, rtol=5e-2)

    print("KERNEL_OK")
</pallas_src>

<mosaic_0001>
module attributes {stable_mosaic.version = 11 : i64} {
  func.func @_fused_mlp_kernel(%arg0: i32, %arg1: memref<8x128xbf16, #tpu.memory_space<vmem>>, %arg2: memref<128x256xbf16, #tpu.memory_space<vmem>>, %arg3: memref<1x256xf32, #tpu.memory_space<vmem>>, %arg4: memref<256x256xbf16, #tpu.memory_space<vmem>>, %arg5: memref<1x256xf32, #tpu.memory_space<vmem>>, %arg6: memref<256x128xbf16, #tpu.memory_space<vmem>>, %arg7: memref<1x128xf32, #tpu.memory_space<vmem>>, %arg8: memref<128x128xbf16, #tpu.memory_space<vmem>>, %arg9: memref<1x128xf32, #tpu.memory_space<vmem>>, %arg10: memref<128x256xbf16, #tpu.memory_space<vmem>>, %arg11: memref<1x256xf32, #tpu.memory_space<vmem>>, %arg12: memref<8x256xf32, #tpu.memory_space<vmem>>) attributes {dimension_semantics = [#tpu.dimension_semantics<parallel>], iteration_bounds = array<i64: 1>, scalar_prefetch = 0 : i64, scratch_operands = 0 : i64, tpu.core_type = #tpu.core_type<tc>, window_params = [{transform_indices = @transform_0, window_bounds = array<i64: 8, 128>}, {pipeline_mode = #tpu.pipeline_mode<synchronous>, transform_indices = @transform_1, window_bounds = array<i64: 128, 256>}, {pipeline_mode = #tpu.pipeline_mode<synchronous>, transform_indices = @transform_2, window_bounds = array<i64: 1, 256>}, {pipeline_mode = #tpu.pipeline_mode<synchronous>, transform_indices = @transform_3, window_bounds = array<i64: 256, 256>}, {pipeline_mode = #tpu.pipeline_mode<synchronous>, transform_indices = @transform_4, window_bounds = array<i64: 1, 256>}, {pipeline_mode = #tpu.pipeline_mode<synchronous>, transform_indices = @transform_5, window_bounds = array<i64: 256, 128>}, {pipeline_mode = #tpu.pipeline_mode<synchronous>, transform_indices = @transform_6, window_bounds = array<i64: 1, 128>}, {pipeline_mode = #tpu.pipeline_mode<synchronous>, transform_indices = @transform_7, window_bounds = array<i64: 128, 128>}, {pipeline_mode = #tpu.pipeline_mode<synchronous>, transform_indices = @transform_8, window_bounds = array<i64: 1, 128>}, {pipeline_mode = #tpu.pipeline_mode<synchronous>, transform_indices = @transform_9, window_bounds = array<i64: 128, 256>}, {pipeline_mode = #tpu.pipeline_mode<synchronous>, transform_indices = @transform_10, window_bounds = array<i64: 1, 256>}, {transform_indices = @transform_11, window_bounds = array<i64: 8, 256>}]} {
    %c0 = arith.constant 0 : index
    %c0_0 = arith.constant 0 : index
    %0 = vector.load %arg1[%c0, %c0_0] : memref<8x128xbf16, #tpu.memory_space<vmem>>, vector<8x128xbf16>
    %c0_1 = arith.constant 0 : index
    %c0_2 = arith.constant 0 : index
    %1 = vector.load %arg2[%c0_1, %c0_2] : memref<128x256xbf16, #tpu.memory_space<vmem>>, vector<128x256xbf16>
    %c0_3 = arith.constant 0 : index
    %c0_4 = arith.constant 0 : index
    %2 = vector.load %arg3[%c0_3, %c0_4] : memref<1x256xf32, #tpu.memory_space<vmem>>, vector<1x256xf32>
    %cst = arith.constant dense<0.000000e+00> : vector<8x256xf32>
    %3 = tpu.matmul %0, %1, %cst {dimension_numbers = #tpu.dot_dimension_numbers<[1], [0], [0], [1], [0, 0, 1, 1], [], []>} : vector<8x128xbf16>, vector<128x256xbf16>, vector<8x256xf32> -> vector<8x256xf32>
    %4 = vector.broadcast %2 : vector<1x256xf32> to vector<8x256xf32>
    %5 = arith.addf %3, %4 : vector<8x256xf32>
    %cst_5 = arith.constant 0.000000e+00 : f32
    %6 = vector.broadcast %cst_5 : f32 to vector<8x256xf32>
    %7 = arith.maximumf %5, %6 : vector<8x256xf32>
    %8 = arith.truncf %7 : vector<8x256xf32> to vector<8x256xbf16>
    %c0_6 = arith.constant 0 : index
    %c0_7 = arith.constant 0 : index
    %9 = vector.load %arg4[%c0_6, %c0_7] : memref<256x256xbf16, #tpu.memory_space<vmem>>, vector<256x256xbf16>
    %c0_8 = arith.constant 0 : index
    %c0_9 = arith.constant 0 : index
    %10 = vector.load %arg5[%c0_8, %c0_9] : memref<1x256xf32, #tpu.memory_space<vmem>>, vector<1x256xf32>
    %cst_10 = arith.constant dense<0.000000e+00> : vector<8x256xf32>
    %11 = tpu.matmul %8, %9, %cst_10 {dimension_numbers = #tpu.dot_dimension_numbers<[1], [0], [0], [1], [0, 0, 1, 1], [], []>} : vector<8x256xbf16>, vector<256x256xbf16>, vector<8x256xf32> -> vector<8x256xf32>
    %12 = vector.broadcast %10 : vector<1x256xf32> to vector<8x256xf32>
    %13 = arith.addf %11, %12 : vector<8x256xf32>
    %cst_11 = arith.constant 0.000000e+00 : f32
    %14 = vector.broadcast %cst_11 : f32 to vector<8x256xf32>
    %15 = arith.maximumf %13, %14 : vector<8x256xf32>
    %16 = arith.truncf %15 : vector<8x256xf32> to vector<8x256xbf16>
    %c0_12 = arith.constant 0 : index
    %c0_13 = arith.constant 0 : index
    %17 = vector.load %arg6[%c0_12, %c0_13] : memref<256x128xbf16, #tpu.memory_space<vmem>>, vector<256x128xbf16>
    %c0_14 = arith.constant 0 : index
    %c0_15 = arith.constant 0 : index
    %18 = vector.load %arg7[%c0_14, %c0_15] : memref<1x128xf32, #tpu.memory_space<vmem>>, vector<1x128xf32>
    %cst_16 = arith.constant dense<0.000000e+00> : vector<8x128xf32>
    %19 = tpu.matmul %16, %17, %cst_16 {dimension_numbers = #tpu.dot_dimension_numbers<[1], [0], [0], [1], [0, 0, 1, 1], [], []>} : vector<8x256xbf16>, vector<256x128xbf16>, vector<8x128xf32> -> vector<8x128xf32>
    %20 = vector.broadcast %18 : vector<1x128xf32> to vector<8x128xf32>
    %21 = arith.addf %19, %20 : vector<8x128xf32>
    %cst_17 = arith.constant 0.000000e+00 : f32
    %22 = vector.broadcast %cst_17 : f32 to vector<8x128xf32>
    %23 = arith.maximumf %21, %22 : vector<8x128xf32>
    %24 = arith.truncf %23 : vector<8x128xf32> to vector<8x128xbf16>
    %c0_18 = arith.constant 0 : index
    %c0_19 = arith.constant 0 : index
    %25 = vector.load %arg8[%c0_18, %c0_19] : memref<128x128xbf16, #tpu.memory_space<vmem>>, vector<128x128xbf16>
    %c0_20 = arith.constant 0 : index
    %c0_21 = arith.constant 0 : index
    %26 = vector.load %arg9[%c0_20, %c0_21] : memref<1x128xf32, #tpu.memory_space<vmem>>, vector<1x128xf32>
    %cst_22 = arith.constant dense<0.000000e+00> : vector<8x128xf32>
    %27 = tpu.matmul %24, %25, %cst_22 {dimension_numbers = #tpu.dot_dimension_numbers<[1], [0], [0], [1], [0, 0, 1, 1], [], []>} : vector<8x128xbf16>, vector<128x128xbf16>, vector<8x128xf32> -> vector<8x128xf32>
    %28 = vector.broadcast %26 : vector<1x128xf32> to vector<8x128xf32>
    %29 = arith.addf %27, %28 : vector<8x128xf32>
    %cst_23 = arith.constant 0.000000e+00 : f32
    %30 = vector.broadcast %cst_23 : f32 to vector<8x128xf32>
    %31 = arith.maximumf %29, %30 : vector<8x128xf32>
    %32 = arith.truncf %31 : vector<8x128xf32> to vector<8x128xbf16>
    %c0_24 = arith.constant 0 : index
    %c0_25 = arith.constant 0 : index
    %33 = vector.load %arg10[%c0_24, %c0_25] : memref<128x256xbf16, #tpu.memory_space<vmem>>, vector<128x256xbf16>
    %c0_26 = arith.constant 0 : index
    %c0_27 = arith.constant 0 : index
    %34 = vector.load %arg11[%c0_26, %c0_27] : memref<1x256xf32, #tpu.memory_space<vmem>>, vector<1x256xf32>
    %cst_28 = arith.constant dense<0.000000e+00> : vector<8x256xf32>
    %35 = tpu.matmul %32, %33, %cst_28 {dimension_numbers = #tpu.dot_dimension_numbers<[1], [0], [0], [1], [0, 0, 1, 1], [], []>} : vector<8x128xbf16>, vector<128x256xbf16>, vector<8x256xf32> -> vector<8x256xf32>
    %36 = vector.broadcast %34 : vector<1x256xf32> to vector<8x256xf32>
    %37 = arith.addf %35, %36 : vector<8x256xf32>
    %c0_29 = arith.constant 0 : index
    %c0_30 = arith.constant 0 : index
    %38 = vector.load %arg12[%c0_29, %c0_30] : memref<8x256xf32, #tpu.memory_space<vmem>>, vector<8x256xf32>
    tpu.vector_store %arg12[%c0_29, %c0_30], %37 {strides = array<i32>} : memref<8x256xf32, #tpu.memory_space<vmem>>, vector<8x256xf32>,
    return
  }
  func.func @transform_0(%arg0: i32) -> (i32, i32) {
    %c0_i32 = arith.constant 0 : i32
    %c0_i32_0 = arith.constant 0 : i32
    return %arg0, %c0_i32 : i32, i32
  }
  func.func @transform_1(%arg0: i32) -> (i32, i32) {
    %c0_i32 = arith.constant 0 : i32
    %c0_i32_0 = arith.constant 0 : i32
    %c0_i32_1 = arith.constant 0 : i32
    return %c0_i32, %c0_i32_0 : i32, i32
  }
  func.func @transform_2(%arg0: i32) -> (i32, i32) {
    %c0_i32 = arith.constant 0 : i32
    %c0_i32_0 = arith.constant 0 : i32
    %c0_i32_1 = arith.constant 0 : i32
    return %c0_i32, %c0_i32_0 : i32, i32
  }
  func.func @transform_3(%arg0: i32) -> (i32, i32) {
    %c0_i32 = arith.constant 0 : i32
    %c0_i32_0 = arith.constant 0 : i32
    %c0_i32_1 = arith.constant 0 : i32
    return %c0_i32, %c0_i32_0 : i32, i32
  }
  func.func @transform_4(%arg0: i32) -> (i32, i32) {
    %c0_i32 = arith.constant 0 : i32
    %c0_i32_0 = arith.constant 0 : i32
    %c0_i32_1 = arith.constant 0 : i32
    return %c0_i32, %c0_i32_0 : i32, i32
  }
  func.func @transform_5(%arg0: i32) -> (i32, i32) {
    %c0_i32 = arith.constant 0 : i32
    %c0_i32_0 = arith.constant 0 : i32
    %c0_i32_1 = arith.constant 0 : i32
    return %c0_i32, %c0_i32_0 : i32, i32
  }
  func.func @transform_6(%arg0: i32) -> (i32, i32) {
    %c0_i32 = arith.constant 0 : i32
    %c0_i32_0 = arith.constant 0 : i32
    %c0_i32_1 = arith.constant 0 : i32
    return %c0_i32, %c0_i32_0 : i32, i32
  }
  func.func @transform_7(%arg0: i32) -> (i32, i32) {
    %c0_i32 = arith.constant 0 : i32
    %c0_i32_0 = arith.constant 0 : i32
    %c0_i32_1 = arith.constant 0 : i32
    return %c0_i32, %c0_i32_0 : i32, i32
  }
  func.func @transform_8(%arg0: i32) -> (i32, i32) {
    %c0_i32 = arith.constant 0 : i32
    %c0_i32_0 = arith.constant 0 : i32
    %c0_i32_1 = arith.constant 0 : i32
    return %c0_i32, %c0_i32_0 : i32, i32
  }
  func.func @transform_9(%arg0: i32) -> (i32, i32) {
    %c0_i32 = arith.constant 0 : i32
    %c0_i32_0 = arith.constant 0 : i32
    %c0_i32_1 = arith.constant 0 : i32
    return %c0_i32, %c0_i32_0 : i32, i32
  }
  func.func @transform_10(%arg0: i32) -> (i32, i32) {
    %c0_i32 = arith.constant 0 : i32
    %c0_i32_0 = arith.constant 0 : i32
    %c0_i32_1 = arith.constant 0 : i32
    return %c0_i32, %c0_i32_0 : i32, i32
  }
  func.func @transform_11(%arg0: i32) -> (i32, i32) {
    %c0_i32 = arith.constant 0 : i32
    %c0_i32_0 = arith.constant 0 : i32
    return %arg0, %c0_i32 : i32, i32
  }
}

module attributes {stable_mosaic.version = 11 : i64} {
  func.func @_fused_mlp_kernel(%arg0: i32, %arg1: memref<8x128xbf16, #tpu.memory_space<vmem>>, %arg2: memref<128x256xbf16, #tpu.memory_space<vmem>>, %arg3: memref<1x256xf32, #tpu.memory_space<vmem>>, %arg4: memref<256x256xbf16, #tpu.memory_space<vmem>>, %arg5: memref<1x256xf32, #tpu.memory_space<vmem>>, %arg6: memref<256x128xbf16, #tpu.memory_space<vmem>>, %arg7: memref<1x128xf32, #tpu.memory_space<vmem>>, %arg8: memref<128x128xbf16, #tpu.memory_space<vmem>>, %arg9: memref<1x128xf32, #tpu.memory_space<vmem>>, %arg10: memref<128x256xbf16, #tpu.memory_space<vmem>>, %arg11: memref<1x256xf32, #tpu.memory_space<vmem>>, %arg12: memref<8x256xf32, #tpu.memory_space<vmem>>) attributes {dimension_semantics = [#tpu.dimension_semantics<parallel>], iteration_bounds = array<i64: 1>, scalar_prefetch = 0 : i64, scratch_operands = 0 : i64, tpu.core_type = #tpu.core_type<tc>, window_params = [{transform_indices = @transform_0, window_bounds = array<i64: 8, 128>}, {pipeline_mode = #tpu.pipeline_mode<synchronous>, transform_indices = @transform_1, window_bounds = array<i64: 128, 256>}, {pipeline_mode = #tpu.pipeline_mode<synchronous>, transform_indices = @transform_2, window_bounds = array<i64: 1, 256>}, {pipeline_mode = #tpu.pipeline_mode<synchronous>, transform_indices = @transform_3, window_bounds = array<i64: 256, 256>}, {pipeline_mode = #tpu.pipeline_mode<synchronous>, transform_indices = @transform_4, window_bounds = array<i64: 1, 256>}, {pipeline_mode = #tpu.pipeline_mode<synchronous>, transform_indices = @transform_5, window_bounds = array<i64: 256, 128>}, {pipeline_mode = #tpu.pipeline_mode<synchronous>, transform_indices = @transform_6, window_bounds = array<i64: 1, 128>}, {pipeline_mode = #tpu.pipeline_mode<synchronous>, transform_indices = @transform_7, window_bounds = array<i64: 128, 128>}, {pipeline_mode = #tpu.pipeline_mode<synchronous>, transform_indices = @transform_8, window_bounds = array<i64: 1, 128>}, {pipeline_mode = #tpu.pipeline_mode<synchronous>, transform_indices = @transform_9, window_bounds = array<i64: 128, 256>}, {pipeline_mode = #tpu.pipeline_mode<synchronous>, transform_indices = @transform_10, window_bounds = array<i64: 1, 256>}, {transform_indices = @transform_11, window_bounds = array<i64: 8, 256>}]} {
    %c0 = arith.constant 0 : index
    %c0_0 = arith.constant 0 : index
    %0 = vector.load %arg1[%c0, %c0_0] : memref<8x128xbf16, #tpu.memory_space<vmem>>, vector<8x128xbf16>
    %c0_1 = arith.constant 0 : index
    %c0_2 = arith.constant 0 : index
    %1 = vector.load %arg2[%c0_1, %c0_2] : memref<128x256xbf16, #tpu.memory_space<vmem>>, vector<128x256xbf16>
    %c0_3 = arith.constant 0 : index
    %c0_4 = arith.constant 0 : index
    %2 = vector.load %arg3[%c0_3, %c0_4] : memref<1x256xf32, #tpu.memory_space<vmem>>, vector<1x256xf32>
    %cst = arith.constant dense<0.000000e+00> : vector<8x256xf32>
    %3 = tpu.matmul %0, %1, %cst {dimension_numbers = #tpu.dot_dimension_numbers<[1], [0], [0], [1], [0, 0, 1, 1], [], []>} : vector<8x128xbf16>, vector<128x256xbf16>, vector<8x256xf32> -> vector<8x256xf32>
    %4 = vector.broadcast %2 : vector<1x256xf32> to vector<8x256xf32>
    %5 = arith.addf %3, %4 : vector<8x256xf32>
    %cst_5 = arith.constant 0.000000e+00 : f32
    %6 = vector.broadcast %cst_5 : f32 to vector<8x256xf32>
    %7 = arith.maximumf %5, %6 : vector<8x256xf32>
    %8 = arith.truncf %7 : vector<8x256xf32> to vector<8x256xbf16>
    %c0_6 = arith.constant 0 : index
    %c0_7 = arith.constant 0 : index
    %9 = vector.load %arg4[%c0_6, %c0_7] : memref<256x256xbf16, #tpu.memory_space<vmem>>, vector<256x256xbf16>
    %c0_8 = arith.constant 0 : index
    %c0_9 = arith.constant 0 : index
    %10 = vector.load %arg5[%c0_8, %c0_9] : memref<1x256xf32, #tpu.memory_space<vmem>>, vector<1x256xf32>
    %cst_10 = arith.constant dense<0.000000e+00> : vector<8x256xf32>
    %11 = tpu.matmul %8, %9, %cst_10 {dimension_numbers = #tpu.dot_dimension_numbers<[1], [0], [0], [1], [0, 0, 1, 1], [], []>} : vector<8x256xbf16>, vector<256x256xbf16>, vector<8x256xf32> -> vector<8x256xf32>
    %12 = vector.broadcast %10 : vector<1x256xf32> to vector<8x256xf32>
    %13 = arith.addf %11, %12 : vector<8x256xf32>
    %cst_11 = arith.constant 0.000000e+00 : f32
    %14 = vector.broadcast %cst_11 : f32 to vector<8x256xf32>
    %15 = arith.maximumf %13, %14 : vector<8x256xf32>
    %16 = arith.truncf %15 : vector<8x256xf32> to vector<8x256xbf16>
    %c0_12 = arith.constant 0 : index
    %c0_13 = arith.constant 0 : index
    %17 = vector.load %arg6[%c0_12, %c0_13] : memref<256x128xbf16, #tpu.memory_space<vmem>>, vector<256x128xbf16>
    %c0_14 = arith.constant 0 : index
    %c0_15 = arith.constant 0 : index
    %18 = vector.load %arg7[%c0_14, %c0_15] : memref<1x128xf32, #tpu.memory_space<vmem>>, vector<1x128xf32>
    %cst_16 = arith.constant dense<0.000000e+00> : vector<8x128xf32>
    %19 = tpu.matmul %16, %17, %cst_16 {dimension_numbers = #tpu.dot_dimension_numbers<[1], [0], [0], [1], [0, 0, 1, 1], [], []>} : vector<8x256xbf16>, vector<256x128xbf16>, vector<8x128xf32> -> vector<8x128xf32>
    %20 = vector.broadcast %18 : vector<1x128xf32> to vector<8x128xf32>
    %21 = arith.addf %19, %20 : vector<8x128xf32>
    %cst_17 = arith.constant 0.000000e+00 : f32
    %22 = vector.broadcast %cst_17 : f32 to vector<8x128xf32>
    %23 = arith.maximumf %21, %22 : vector<8x128xf32>
    %24 = arith.truncf %23 : vector<8x128xf32> to vector<8x128xbf16>
    %c0_18 = arith.constant 0 : index
    %c0_19 = arith.constant 0 : index
    %25 = vector.load %arg8[%c0_18, %c0_19] : memref<128x128xbf16, #tpu.memory_space<vmem>>, vector<128x128xbf16>
    %c0_20 = arith.constant 0 : index
    %c0_21 = arith.constant 0 : index
    %26 = vector.load %arg9[%c0_20, %c0_21] : memref<1x128xf32, #tpu.memory_space<vmem>>, vector<1x128xf32>
    %cst_22 = arith.constant dense<0.000000e+00> : vector<8x128xf32>
    %27 = tpu.matmul %24, %25, %cst_22 {dimension_numbers = #tpu.dot_dimension_numbers<[1], [0], [0], [1], [0, 0, 1, 1], [], []>} : vector<8x128xbf16>, vector<128x128xbf16>, vector<8x128xf32> -> vector<8x128xf32>
    %28 = vector.broadcast %26 : vector<1x128xf32> to vector<8x128xf32>
    %29 = arith.addf %27, %28 : vector<8x128xf32>
    %cst_23 = arith.constant 0.000000e+00 : f32
    %30 = vector.broadcast %cst_23 : f32 to vector<8x128xf32>
    %31 = arith.maximumf %29, %30 : vector<8x128xf32>
    %32 = arith.truncf %31 : vector<8x128xf32> to vector<8x128xbf16>
    %c0_24 = arith.constant 0 : index
    %c0_25 = arith.constant 0 : index
    %33 = vector.load %arg10[%c0_24, %c0_25] : memref<128x256xbf16, #tpu.memory_space<vmem>>, vector<128x256xbf16>
    %c0_26 = arith.constant 0 : index
    %c0_27 = arith.constant 0 : index
    %34 = vector.load %arg11[%c0_26, %c0_27] : memref<1x256xf32, #tpu.memory_space<vmem>>, vector<1x256xf32>
    %cst_28 = arith.constant dense<0.000000e+00> : vector<8x256xf32>
    %35 = tpu.matmul %32, %33, %cst_28 {dimension_numbers = #tpu.dot_dimension_numbers<[1], [0], [0], [1], [0, 0, 1, 1], [], []>} : vector<8x128xbf16>, vector<128x256xbf16>, vector<8x256xf32> -> vector<8x256xf32>
    %36 = vector.broadcast %34 : vector<1x256xf32> to vector<8x256xf32>
    %37 = arith.addf %35, %36 : vector<8x256xf32>
    %c0_29 = arith.constant 0 : index
    %c0_30 = arith.constant 0 : index
    %38 = vector.load %arg12[%c0_29, %c0_30] : memref<8x256xf32, #tpu.memory_space<vmem>>, vector<8x256xf32>
    tpu.vector_store %arg12[%c0_29, %c0_30], %37 {strides = array<i32>} : memref<8x256xf32, #tpu.memory_space<vmem>>, vector<8x256xf32>,
    return
  }
  func.func @transform_0(%arg0: i32) -> (i32, i32) {
    %c0_i32 = arith.constant 0 : i32
    %c0_i32_0 = arith.constant 0 : i32
    return %arg0, %c0_i32 : i32, i32
  }
  func.func @transform_1(%arg0: i32) -> (i32, i32) {
    %c0_i32 = arith.constant 0 : i32
    %c0_i32_0 = arith.constant 0 : i32
    %c0_i32_1 = arith.constant 0 : i32
    return %c0_i32, %c0_i32_0 : i32, i32
  }
  func.func @transform_2(%arg0: i32) -> (i32, i32) {
    %c0_i32 = arith.constant 0 : i32
    %c0_i32_0 = arith.constant 0 : i32
    %c0_i32_1 = arith.constant 0 : i32
    return %c0_i32, %c0_i32_0 : i32, i32
  }
  func.func @transform_3(%arg0: i32) -> (i32, i32) {
    %c0_i32 = arith.constant 0 : i32
    %c0_i32_0 = arith.constant 0 : i32
    %c0_i32_1 = arith.constant 0 : i32
    return %c0_i32, %c0_i32_0 : i32, i32
  }
  func.func @transform_4(%arg0: i32) -> (i32, i32) {
    %c0_i32 = arith.constant 0 : i32
    %c0_i32_0 = arith.constant 0 : i32
    %c0_i32_1 = arith.constant 0 : i32
    return %c0_i32, %c0_i32_0 : i32, i32
  }
  func.func @transform_5(%arg0: i32) -> (i32, i32) {
    %c0_i32 = arith.constant 0 : i32
    %c0_i32_0 = arith.constant 0 : i32
    %c0_i32_1 = arith.constant 0 : i32
    return %c0_i32, %c0_i32_0 : i32, i32
  }
  func.func @transform_6(%arg0: i32) -> (i32, i32) {
    %c0_i32 = arith.constant 0 : i32
    %c0_i32_0 = arith.constant 0 : i32
    %c0_i32_1 = arith.constant 0 : i32
    return %c0_i32, %c0_i32_0 : i32, i32
  }
  func.func @transform_7(%arg0: i32) -> (i32, i32) {
    %c0_i32 = arith.constant 0 : i32
    %c0_i32_0 = arith.constant 0 : i32
    %c0_i32_1 = arith.constant 0 : i32
    return %c0_i32, %c0_i32_0 : i32, i32
  }
  func.func @transform_8(%arg0: i32) -> (i32, i32) {
    %c0_i32 = arith.constant 0 : i32
    %c0_i32_0 = arith.constant 0 : i32
    %c0_i32_1 = arith.constant 0 : i32
    return %c0_i32, %c0_i32_0 : i32, i32
  }
  func.func @transform_9(%arg0: i32) -> (i32, i32) {
    %c0_i32 = arith.constant 0 : i32
    %c0_i32_0 = arith.constant 0 : i32
    %c0_i32_1 = arith.constant 0 : i32
    return %c0_i32, %c0_i32_0 : i32, i32
  }
  func.func @transform_10(%arg0: i32) -> (i32, i32) {
    %c0_i32 = arith.constant 0 : i32
    %c0_i32_0 = arith.constant 0 : i32
    %c0_i32_1 = arith.constant 0 : i32
    return %c0_i32, %c0_i32_0 : i32, i32
  }
  func.func @transform_11(%arg0: i32) -> (i32, i32) {
    %c0_i32 = arith.constant 0 : i32
    %c0_i32_0 = arith.constant 0 : i32
    return %arg0, %c0_i32 : i32, i32
  }
}

</mosaic_0001>

<bundles_post_ra>
// kernel: tpu_custom_call.1
= control target key start
LH: loop header
LB: loop body
LE: loop exit
PB: predicated region body
PF: predicated region fallthrough
CT: control target
= control target key end

     0   :  { %16 = vsyncpa [#allocation3], 0  ;;  %s1697_s0 = inlined_call_operand.hbm [shape: bf16[8,128], index: 0, kind: input, shape index: {}]   ;;  %s1698_s1 = inlined_call_operand.hbm [shape: bf16[128,256], index: 1, kind: input, shape index: {}]   ;;  %s1699_s2 = inlined_call_operand.hbm [shape: f32[1,256], index: 2, kind: input, shape index: {}]   ;;  %s1700_s3 = inlined_call_operand.hbm [shape: bf16[256,256], index: 3, kind: input, shape index: {}]   ;;  %s1701_s4 = inlined_call_operand.vmem [shape: f32[1,256], index: 4, kind: input, shape index: {}]   ;;  %s1702_s5 = inlined_call_operand.hbm [shape: bf16[256,128], index: 5, kind: input, shape index: {}]   ;;  %s1703_s6 = inlined_call_operand.vmem [shape: f32[1,128], index: 6, kind: input, shape index: {}]   ;;  %s1704_s7 = inlined_call_operand.hbm [shape: bf16[128,128], index: 7, kind: input, shape index: {}]   ;;  %s1705_s8 = inlined_call_operand.vmem [shape: f32[1,128], index: 8, kind: input, shape index: {}]   ;;  %s1706_s9 = inlined_call_operand.hbm [shape: bf16[128,256], index: 9, kind: input, shape index: {}]   ;;  %s1707_s10 = inlined_call_operand.vmem [shape: f32[1,256], index: 10, kind: input, shape index: {}]   ;;  %s1708_s11 = inlined_call_operand.hbm [shape: f32[8,256], index: 11, kind: output, shape index: {}]  }
   0x1   :  { %17 = vsyncpa [#allocation6], 0 }
   0x2   :  { %18 = vsyncpa [#allocation9], 0 }
   0x3   :  { %19 = vsyncpa [#allocation12], 0  ;;  %s36_s19 = sshll.u32 %s1698_s1, 4  ;;  %s37_s19 = int_to_ptr.hbm [resolvable:$true] %s36_s19 }
   0x4   :  { %20 = vsyncpa [#allocation4], 0  ;;  %s1580_s20 = smov [#allocation5]   ;;  %s60_s24 = sshll.u32 %s1700_s3, 4  ;;  %s61_s24 = int_to_ptr.hbm [resolvable:$true] %s60_s24 }
   0x5   :  { %s38_s21 = sshll.u32 %s1580_s20, 4  ;;  %s1581_s25 = smov 128   ;;  %s39_s21 = int_to_ptr.vmem [resolvable:$true] %s38_s21 }
   0x6   :  { %s1582_s26 = smov 8   ;;  %s1583_s27 = smov [#allocation8]  }
   0x7   :  { %44 = dma.hbm_to_vmem [thread:$0]  %s37_s19, 2048, %s39_s21, [#allocation6], %s1581_s25, %s1581_s25, %s1582_s26  }
   0x8   :  { %s62_s28 = sshll.u32 %s1583_s27, 4  ;;  %s90_s30 = sshll.u32 %s1704_s7, 4  ;;  %s63_s28 = int_to_ptr.vmem [resolvable:$true] %s62_s28  ;;  %s91_s30 = int_to_ptr.hbm [resolvable:$true] %s90_s30 }
   0x9   :  { %68 = dma.hbm_to_vmem [thread:$0]  %s61_s24, 4096, %s63_s28, [#allocation9], %s1581_s25, %s1581_s25, %s1582_s26  }
   0xa   :  { %s1584_s3 = smov [#allocation11]   ;;  %s26_s15 = sshll.u32 %s1697_s0, 4  ;;  %s27_s15 = int_to_ptr.hbm [resolvable:$true] %s26_s15 }
   0xb   :  { %s92_s12 = sshll.u32 %s1584_s3, 4  ;;  %s1585_s16 = smov 64   ;;  %s93_s12 = int_to_ptr.vmem [resolvable:$true] %s92_s12 }
   0xc   :  { %s1586_s17 = smov 4   ;;  %s1587_s18 = smov [#allocation2]  }
   0xd   :  { %98 = dma.hbm_to_vmem [thread:$0]  %s91_s30, 1024, %s93_s12, [#allocation12], %s1585_s16, %s1585_s16, %s1586_s17  }
   0xe   :  { %s28_s19 = sshll.u32 %s1587_s18, 4  ;;  %s50_s22 = sshll.u32 %s1699_s2, 4  ;;  %s29_s19 = int_to_ptr.vmem [resolvable:$true] %s28_s19  ;;  %s51_s22 = int_to_ptr.hbm [resolvable:$true] %s50_s22 }
   0xf   :  { %31 = dma.hbm_to_vmem [thread:$0]  %s27_s15, 64, %s29_s19, [#allocation3]  }
  0x10   :  { %s75_s24 = sshll.u32 %s1702_s5, 4  ;;  %s1588_s27 = smov [#allocation7]   ;;  %s76_s24 = int_to_ptr.hbm [resolvable:$true] %s75_s24 }
  0x11   :  { %s52_s28 = sshll.u32 %s1588_s27, 4  ;;  %s1589_s0 = smov [#allocation10]   ;;  %s53_s28 = int_to_ptr.vmem [resolvable:$true] %s52_s28 }
  0x12   :  { %55 = dma.hbm_to_vmem [thread:$0]  %s51_s22, 32, %s53_s28, [#allocation6]  }
  0x13   :  { %s77_s1 = sshll.u32 %s1589_s0, 4  ;;  %s105_s3 = sshll.u32 %s1706_s9, 4  ;;  %s78_s1 = int_to_ptr.vmem [resolvable:$true] %s77_s1  ;;  %s106_s3 = int_to_ptr.hbm [resolvable:$true] %s105_s3 }
  0x14   :  { %83 = dma.hbm_to_vmem [thread:$0]  %s76_s24, 2048, %s78_s1, [#allocation9], %s1585_s16, %s1585_s16, %s1586_s17  }
  0x15   :  { %s1590_s2 = smov [#allocation13]  }
  0x16   :  { %s107_s12 = sshll.u32 %s1590_s2, 4  ;;  %s108_s12 = int_to_ptr.vmem [resolvable:$true] %s107_s12 }
  0x17   :  { %113 = dma.hbm_to_vmem [thread:$0]  %s106_s3, 2048, %s108_s12, [#allocation12], %s1581_s25, %s1581_s25, %s1582_s26  }
  0x18   :  { %1570 = dma.done.wait [#allocation3], 64  }
  0x19   :  { %1571 = vsyncadd [#allocation3], 4294967232 }
  0x1a   :  { %1572 = dma.done.wait [#allocation6], 2080  }
  0x1b   :  { %1573 = vsyncadd [#allocation6], 4294965216 }
  0x1c   :  { %1574 = dma.done.wait [#allocation9], 6144  }
  0x1d   :  { %1575 = vsyncadd [#allocation9], 4294961152 }
  0x1e   :  { %1576 = dma.done.wait [#allocation12], 3072  }
  0x1f   :  { %1577 = vsyncadd [#allocation12], 4294964224  ;;  %v982_v0 = vld [vmem:[#allocation5 + $0x70] sm:$0xf]  ;;  %v1291_v1 = vld [vmem:[#allocation5 + $0x74] sm:$0xf0] }
  0x20   :  { %v1290_v2 = vld [vmem:[#allocation5 + $0x74] sm:$0xf]  ;;  %v983_v3 = vor.u32 %v1291_v1, %v982_v0  ;;  %v984_v4 = vld [vmem:[#allocation5 + $0x78] sm:$0xf0]  ;;  %v974_v5 = vld [vmem:[#allocation5 + $0x60] sm:$0xf] }
  0x21   :  { %v1289_v6 = vld [vmem:[#allocation5 + $0x64] sm:$0xf0]  ;;  %v987_v7 = vor.u32 %v1290_v2, %v984_v4  ;;  %v1288_v8 = vld [vmem:[#allocation5 + $0x64] sm:$0xf]  ;;  %v976_v9 = vld [vmem:[#allocation5 + $0x68] sm:$0xf0] }
  0x22   :  { %247 = vmatpush.bf16.msra.mxu0 %v983_v3  ;;  %v975_v10 = vor.u32 %v1289_v6, %v974_v5  ;;  %v979_v11 = vor.u32 %v1288_v8, %v976_v9  ;;  %v966_v12 = vld [vmem:[#allocation5 + $0x50] sm:$0xf]  ;;  %v1287_v13 = vld [vmem:[#allocation5 + $0x54] sm:$0xf0]  ;;  %v1286_v14 = vld [vmem:[#allocation5 + $0x54] sm:$0xf] }
  0x23   :  { %260 = vmatpush.bf16.msra.mxu1 %v987_v7  ;;  %v968_v15 = vld [vmem:[#allocation5 + $0x58] sm:$0xf0]  ;;  %v967_v16 = vor.u32 %v1287_v13, %v966_v12  ;;  %v958_v18 = vld [vmem:[#allocation5 + $0x40] sm:$0xf]  ;;  %v1285_v19 = vld [vmem:[#allocation5 + $0x44] sm:$0xf0] }
  0x24   :  { %v971_v17 = vor.u32 %v1286_v14, %v968_v15  ;;  %v1284_v20 = vld [vmem:[#allocation5 + $0x44] sm:$0xf]  ;;  %v960_v21 = vld [vmem:[#allocation5 + $0x48] sm:$0xf0]  ;;  %v959_v22 = vor.u32 %v1285_v19, %v958_v18  ;;  %v1046_v23 = vld [vmem:[#allocation8 + $0x70] sm:$0xf] }
  0x25   :  { %v1307_v24 = vld [vmem:[#allocation8 + $0x74] sm:$0xf0]  ;;  %v1110_v25 = vld [vmem:[#allocation8 + $0xf0] sm:$0xf]  ;;  %v963_v26 = vor.u32 %v1284_v20, %v960_v21  ;;  %v1038_v34 = vld [vmem:[#allocation8 + $0x60] sm:$0xf] }
  0x26   :  { %248 = vmatpush.bf16.msra.mxu0 %v975_v10  ;;  %v950_v27 = vld [vmem:[#allocation5 + $0x30] sm:$0xf]  ;;  %v1283_v28 = vld [vmem:[#allocation5 + $0x34] sm:$0xf0]  ;;  %v1047_v29 = vor.u32 %v1307_v24, %v1046_v23  ;;  %v1282_v31 = vld [vmem:[#allocation5 + $0x34] sm:$0xf] }
  0x27   :  { %261 = vmatpush.bf16.msra.mxu1 %v979_v11  ;;  %v1323_v30 = vld [vmem:[#allocation8 + $0xf4] sm:$0xf0]  ;;  %v1305_v35 = vld [vmem:[#allocation8 + $0x64] sm:$0xf0]  ;;  %v1102_v36 = vld [vmem:[#allocation8 + $0xe0] sm:$0xf]  ;;  %v951_v38 = vor.u32 %v1283_v28, %v950_v27 }
  0x28   :  { %v952_v32 = vld [vmem:[#allocation5 + $0x38] sm:$0xf0]  ;;  %v1111_v33 = vor.u32 %v1323_v30, %v1110_v25  ;;  %475 = vmatpush.bf16.msra.mxu2 %v1047_v29  ;;  %v1321_v37 = vld [vmem:[#allocation8 + $0xe4] sm:$0xf0]  ;;  %v942_v39 = vld [vmem:[#allocation5 + $0x20] sm:$0xf]  ;;  %v1039_v41 = vor.u32 %v1305_v35, %v1038_v34 }
  0x29   :  { %v1281_v40 = vld [vmem:[#allocation5 + $0x24] sm:$0xf0]  ;;  %v1103_v42 = vor.u32 %v1321_v37, %v1102_v36  ;;  %v955_v43 = vor.u32 %v1282_v31, %v952_v32  ;;  %v1280_v44 = vld [vmem:[#allocation5 + $0x24] sm:$0xf]  ;;  %v1030_v45 = vld [vmem:[#allocation8 + $0x50] sm:$0xf] }
  0x2a   :  { %249 = vmatpush.bf16.msra.mxu0 %v967_v16  ;;  %488 = vmatpush.bf16.msra.mxu3 %v1111_v33  ;;  %v1303_v46 = vld [vmem:[#allocation8 + $0x54] sm:$0xf0]  ;;  %v944_v47 = vld [vmem:[#allocation5 + $0x28] sm:$0xf0]  ;;  %v1094_v48 = vld [vmem:[#allocation8 + $0xd0] sm:$0xf]  ;;  %v943_v51 = vor.u32 %v1281_v40, %v942_v39 }
  0x2b   :  { %262 = vmatpush.bf16.msra.mxu1 %v971_v17  ;;  %v1319_v49 = vld [vmem:[#allocation8 + $0xd4] sm:$0xf0]  ;;  %v1031_v50 = vor.u32 %v1303_v46, %v1030_v45  ;;  %v934_v52 = vld [vmem:[#allocation5 + $0x10] sm:$0xf]  ;;  %v1022_v54 = vld [vmem:[#allocation8 + $0x40] sm:$0xf]  ;;  %v947_v56 = vor.u32 %v1280_v44, %v944_v47 }
  0x2c   :  { %476 = vmatpush.bf16.msra.mxu2 %v1039_v41  ;;  %v1095_v53 = vor.u32 %v1319_v49, %v1094_v48  ;;  %v1301_v55 = vld [vmem:[#allocation8 + $0x44] sm:$0xf0]  ;;  %v1279_v57 = vld [vmem:[#allocation5 + $0x14] sm:$0xf0]  ;;  %v1086_v58 = vld [vmem:[#allocation8 + $0xc0] sm:$0xf] }
  0x2d   :  { %v1317_v59 = vld [vmem:[#allocation8 + $0xc4] sm:$0xf0]  ;;  %v1278_v60 = vld [vmem:[#allocation5 + $0x14] sm:$0xf]  ;;  %v936_v61 = vld [vmem:[#allocation5 + $0x18] sm:$0xf0]  ;;  %v1023_v63 = vor.u32 %v1301_v55, %v1022_v54  ;;  %v935_v0 = vor.u32 %v1279_v57, %v934_v52 }
  0x2e   :  { %250 = vmatpush.bf16.msra.mxu0 %v959_v22  ;;  %489 = vmatpush.bf16.msra.mxu3 %v1103_v42  ;;  %v926_v62 = vld [vmem:[#allocation5] sm:$0xf]  ;;  %v1277_v1 = vld [vmem:[#allocation5 + $0x4] sm:$0xf0]  ;;  %v1087_v2 = vor.u32 %v1317_v59, %v1086_v58  ;;  %v1014_v3 = vld [vmem:[#allocation8 + $0x30] sm:$0xf]  ;;  %v939_v5 = vor.u32 %v1278_v60, %v936_v61 }
  0x2f   :  { %263 = vmatpush.bf16.msra.mxu1 %v963_v26  ;;  %v1299_v4 = vld [vmem:[#allocation8 + $0x34] sm:$0xf0]  ;;  %v1276_v6 = vld [vmem:[#allocation5 + $0x4] sm:$0xf]  ;;  %v1078_v7 = vld [vmem:[#allocation8 + $0xb0] sm:$0xf]  ;;  %v927_v16 = vor.u32 %v1277_v1, %v926_v62 }
  0x30   :  { %477 = vmatpush.bf16.msra.mxu2 %v1031_v50  ;;  %v1315_v8 = vld [vmem:[#allocation8 + $0xb4] sm:$0xf0]  ;;  %v928_v9 = vld [vmem:[#allocation5 + $0x8] sm:$0xf0]  ;;  %v1306_v10 = vld [vmem:[#allocation8 + $0x74] sm:$0xf]  ;;  %v1015_v14 = vor.u32 %v1299_v4, %v1014_v3 }
  0x31   :  { %v1048_v11 = vld [vmem:[#allocation8 + $0x78] sm:$0xf0]  ;;  %v1322_v12 = vld [vmem:[#allocation8 + $0xf4] sm:$0xf]  ;;  %v1006_v15 = vld [vmem:[#allocation8 + $0x20] sm:$0xf]  ;;  %v1079_v17 = vor.u32 %v1315_v8, %v1078_v7  ;;  %v931_v19 = vor.u32 %v1276_v6, %v928_v9 }
  0x32   :  { %251 = vmatpush.bf16.msra.mxu0 %v951_v38  ;;  %490 = vmatpush.bf16.msra.mxu3 %v1095_v53  ;;  %v1112_v13 = vld [vmem:[#allocation8 + $0xf8] sm:$0xf0]  ;;  %v1297_v18 = vld [vmem:[#allocation8 + $0x24] sm:$0xf0]  ;;  %v1051_v20 = vor.u32 %v1306_v10, %v1048_v11  ;;  %v1070_v21 = vld [vmem:[#allocation8 + $0xa0] sm:$0xf] }
  0x33   :  { %264 = vmatpush.bf16.msra.mxu1 %v955_v43  ;;  %v1313_v22 = vld [vmem:[#allocation8 + $0xa4] sm:$0xf0]  ;;  %v1115_v23 = vor.u32 %v1322_v12, %v1112_v13  ;;  %v1304_v24 = vld [vmem:[#allocation8 + $0x64] sm:$0xf]  ;;  %v1040_v25 = vld [vmem:[#allocation8 + $0x68] sm:$0xf0]  ;;  %v1007_v28 = vor.u32 %v1297_v18, %v1006_v15 }
  0x34   :  { %478 = vmatpush.bf16.msra.mxu2 %v1023_v63  ;;  %v1320_v26 = vld [vmem:[#allocation8 + $0xe4] sm:$0xf]  ;;  %v1104_v27 = vld [vmem:[#allocation8 + $0xe8] sm:$0xf0]  ;;  %v144_v29 = vld [vmem:[#allocation2] sm:$0xf]  ;;  %v1071_v30 = vor.u32 %v1313_v22, %v1070_v21  ;;  %v1043_v31 = vor.u32 %v1304_v24, %v1040_v25 }
  0x35   :  { %v1107_v32 = vor.u32 %v1320_v26, %v1104_v27  ;;  %v1302_v33 = vld [vmem:[#allocation8 + $0x54] sm:$0xf]  ;;  %v1032_v34 = vld [vmem:[#allocation8 + $0x58] sm:$0xf0]  ;;  %v1300_v39 = vld [vmem:[#allocation8 + $0x44] sm:$0xf] }
  0x36   :  { %252 = vmatpush.bf16.msra.mxu0 %v943_v51  ;;  %491 = vmatpush.bf16.msra.mxu3 %v1087_v2  ;;  %v1318_v35 = vld [vmem:[#allocation8 + $0xd4] sm:$0xf]  ;;  %v1096_v36 = vld [vmem:[#allocation8 + $0xd8] sm:$0xf0]  ;;  %v1035_v37 = vor.u32 %v1302_v33, %v1032_v34  ;;  %v1024_v40 = vld [vmem:[#allocation8 + $0x48] sm:$0xf0] }
  0x37   :  { %265 = vmatpush.bf16.msra.mxu1 %v947_v56  ;;  %v1099_v38 = vor.u32 %v1318_v35, %v1096_v36  ;;  %v1316_v41 = vld [vmem:[#allocation8 + $0xc4] sm:$0xf]  ;;  %v1088_v42 = vld [vmem:[#allocation8 + $0xc8] sm:$0xf0]  ;;  %v1027_v43 = vor.u32 %v1300_v39, %v1024_v40  ;;  %v1298_v45 = vld [vmem:[#allocation8 + $0x34] sm:$0xf] }
  0x38   :  { %479 = vmatpush.bf16.msra.mxu2 %v1015_v14  ;;  %v1091_v44 = vor.u32 %v1316_v41, %v1088_v42  ;;  %v1016_v46 = vld [vmem:[#allocation8 + $0x38] sm:$0xf0]  ;;  %v1314_v47 = vld [vmem:[#allocation8 + $0xb4] sm:$0xf]  ;;  %v1296_v51 = vld [vmem:[#allocation8 + $0x24] sm:$0xf] }
  0x39   :  { %v1080_v48 = vld [vmem:[#allocation8 + $0xb8] sm:$0xf0]  ;;  %v1019_v49 = vor.u32 %v1298_v45, %v1016_v46  ;;  %v1008_v52 = vld [vmem:[#allocation8 + $0x28] sm:$0xf0]  ;;  %v1312_v53 = vld [vmem:[#allocation8 + $0xa4] sm:$0xf] }
  0x3a   :  { %253 = vmatpush.bf16.msra.mxu0 %v935_v0  ;;  %492 = vmatpush.bf16.msra.mxu3 %v1079_v17  ;;  %v1083_v50 = vor.u32 %v1314_v47, %v1080_v48  ;;  %v1072_v54 = vld [vmem:[#allocation8 + $0xa8] sm:$0xf0]  ;;  %v1011_v55 = vor.u32 %v1296_v51, %v1008_v52  ;;  %v998_v57 = vld [vmem:[#allocation8 + $0x10] sm:$0xf]  ;;  %v1295_v58 = vld [vmem:[#allocation8 + $0x14] sm:$0xf0] }
  0x3b   :  { %266 = vmatpush.bf16.msra.mxu1 %v939_v5  ;;  %v1075_v56 = vor.u32 %v1312_v53, %v1072_v54  ;;  %v1062_v59 = vld [vmem:[#allocation8 + $0x90] sm:$0xf]  ;;  %v999_v60 = vor.u32 %v1295_v58, %v998_v57  ;;  %v1311_v61 = vld [vmem:[#allocation8 + $0x94] sm:$0xf0]  ;;  %v1294_v62 = vld [vmem:[#allocation8 + $0x14] sm:$0xf] }
  0x3c   :  { %480 = vmatpush.bf16.msra.mxu2 %v1007_v28  ;;  %v1000_v63 = vld [vmem:[#allocation8 + $0x18] sm:$0xf0]  ;;  %v1063_v0 = vor.u32 %v1311_v61, %v1062_v59  ;;  %v1310_v2 = vld [vmem:[#allocation8 + $0x94] sm:$0xf]  ;;  %v990_v5 = vld [vmem:[#allocation8] sm:$0xf] }
  0x3d   :  { %v1003_v1 = vor.u32 %v1294_v62, %v1000_v63  ;;  %v1064_v3 = vld [vmem:[#allocation8 + $0x98] sm:$0xf0]  ;;  %v1293_v6 = vld [vmem:[#allocation8 + $0x4] sm:$0xf0]  ;;  %v1054_v7 = vld [vmem:[#allocation8 + $0x80] sm:$0xf] }
  0x3e   :  { %254 = vmatpush.bf16.msra.mxu0 %v927_v16  ;;  %493 = vmatpush.bf16.msra.mxu3 %v1071_v30  ;;  %v1067_v4 = vor.u32 %v1310_v2, %v1064_v3  ;;  %v991_v8 = vor.u32 %v1293_v6, %v990_v5  ;;  %v1309_v9 = vld [vmem:[#allocation8 + $0x84] sm:$0xf0]  ;;  %v1292_v10 = vld [vmem:[#allocation8 + $0x4] sm:$0xf]  ;;  %v992_v11 = vld [vmem:[#allocation8 + $0x8] sm:$0xf0] }
  0x3f   :  { %267 = vmatpush.bf16.msra.mxu1 %v931_v19  ;;  %v1055_v12 = vor.u32 %v1309_v9, %v1054_v7  ;;  %v995_v13 = vor.u32 %v1292_v10, %v992_v11  ;;  %v1308_v14 = vld [vmem:[#allocation8 + $0x84] sm:$0xf]  ;;  %v1056_v15 = vld [vmem:[#allocation8 + $0x88] sm:$0xf0]  ;;  %v1339_v17 = vld [vmem:[#allocation10 + $0x78] sm:$0xff]  ;;  %s1591_s15 = smov [#allocation14]  }
  0x40   :  { %481 = vmatpush.bf16.msra.mxu2 %v999_v60  ;;  %v1059_v16 = vor.u32 %v1308_v14, %v1056_v15  ;;  %v1331_v18 = vld [vmem:[#allocation10 + $0x38] sm:$0xff]  ;;  %v1338_v19 = vld [vmem:[#allocation10 + $0x70] sm:$0xff]  ;;  %v1337_v21 = vld [vmem:[#allocation10 + $0x68] sm:$0xff]  ;;  %s909_s16 = sshll.u32 %s1591_s15, 4  ;;  %s911_s18 = sshll.u32 %s1708_s11, 4  ;;  %s910_s16 = int_to_ptr.vmem [resolvable:$true] %s909_s16  ;;  %s912_s18 = int_to_ptr.hbm [resolvable:$true] %s911_s18 }
  0x41   :  { %255 = vmatmul.bf16.vlgmr.msra.gmra.mxu0 %v144_v29  ;;  %v1329_v22 = vld [vmem:[#allocation10 + $0x28] sm:$0xff]  ;;  %v1328_v24 = vld [vmem:[#allocation10 + $0x20] sm:$0xff]  ;;  %v1335_v25 = vld [vmem:[#allocation10 + $0x58] sm:$0xff] }
  0x42   :  { %501 = vmatpush.bf16.msrb.mxu0 %v1051_v20  ;;  %268 = vmatmul.bf16.vlgmr.msra.gmra.mxu1 %v144_v29  ;;  %v1330_v20 = vld [vmem:[#allocation10 + $0x30] sm:$0xff]  ;;  %v161_v26 = vld [vmem:[#allocation7] sm:$0x3]  ;;  %v1333_v41 = vld [vmem:[#allocation10 + $0x48] sm:$0xff] }
  0x43   :  { %514 = vmatpush.bf16.msrb.mxu1 %v1115_v23  ;;  %494 = vmatpush.bf16.msra.mxu3 %v1063_v0  ;;  %v1336_v23 = vld [vmem:[#allocation10 + $0x60] sm:$0xff]  ;;  %v1334_v27 = vld [vmem:[#allocation10 + $0x50] sm:$0xff]  ;;  %v163_v28 = vperm.slane %v161_v26, 0  ;;  %v164_v29 = vperm.slane %v161_v26, 1  ;;  %v1327_v40 = vld [vmem:[#allocation10 + $0x18] sm:$0xff] }
  0x44   :  { %482 = vmatpush.bf16.msra.mxu2 %v991_v8  ;;  %v1326_v42 = vld [vmem:[#allocation10 + $0x10] sm:$0xff]  ;;  %v1324_v45 = vld [vmem:[#allocation10] sm:$0xff]  ;;  %v1347_v46 = vld [vmem:[#allocation11 + $0x38] sm:$0xff] }
  0x45   :  { %v1346_v47 = vld [vmem:[#allocation11 + $0x30] sm:$0xff]  ;;  %v1345_v48 = vld [vmem:[#allocation11 + $0x28] sm:$0xff]  ;;  %v1343_v5 = vld [vmem:[#allocation11 + $0x18] sm:$0xff] }
  0x46   :  { %502 = vmatpush.bf16.msrb.mxu0 %v1043_v31  ;;  %v1342_v6 = vld [vmem:[#allocation11 + $0x10] sm:$0xff]  ;;  %v1341_v7 = vld [vmem:[#allocation11 + $0x8] sm:$0xff]  ;;  %v1340_v8 = vld [vmem:[#allocation11] sm:$0xff] }
  0x47   :  { %515 = vmatpush.bf16.msrb.mxu1 %v1107_v32  ;;  %495 = vmatpush.bf16.msra.mxu3 %v1055_v12  ;;  %v1270_v9 = vld [vmem:[#allocation13 + $0x70] sm:$0xf]  ;;  %v1363_v10 = vld [vmem:[#allocation13 + $0x74] sm:$0xf0]  ;;  %v1362_v11 = vld [vmem:[#allocation13 + $0x74] sm:$0xf] }
  0x48   :  { %663 = vmatpush.bf16.msrb.mxu2 %v1331_v18  ;;  %v1271_v12 = vor.u32 %v1363_v10, %v1270_v9  ;;  %v1262_v14 = vld [vmem:[#allocation13 + $0x60] sm:$0xf]  ;;  %v1361_v15 = vld [vmem:[#allocation13 + $0x64] sm:$0xf0]  ;;  %v1264_v18 = vld [vmem:[#allocation13 + $0x68] sm:$0xf0] }
  0x4a   :  { %503 = vmatpush.bf16.msrb.mxu0 %v1035_v37 }
  0x4b   :  { %516 = vmatpush.bf16.msrb.mxu1 %v1099_v38  ;;  %676 = vmatpush.bf16.msrb.mxu3 %v1339_v17  ;;  %v1360_v17 = vld [vmem:[#allocation13 + $0x64] sm:$0xf] }
  0x4c   :  { %664 = vmatpush.bf16.msrb.mxu2 %v1330_v20  ;;  %v1267_v20 = vor.u32 %v1360_v17, %v1264_v18 }
  0x4e   :  { %504 = vmatpush.bf16.msrb.mxu0 %v1027_v43  ;;  %v1332_v43 = vld [vmem:[#allocation10 + $0x40] sm:$0xff] }
  0x4f   :  { %517 = vmatpush.bf16.msrb.mxu1 %v1091_v44  ;;  %677 = vmatpush.bf16.msrb.mxu3 %v1338_v19  ;;  %v1325_v44 = vld [vmem:[#allocation10 + $0x8] sm:$0xff]  ;;  %v1263_v19 = vor.u32 %v1361_v15, %v1262_v14 }
  0x50   :  { %665 = vmatpush.bf16.msrb.mxu2 %v1329_v22  ;;  %v1359_v22 = vld [vmem:[#allocation13 + $0x54] sm:$0xf0] }
  0x52   :  { %505 = vmatpush.bf16.msrb.mxu0 %v1019_v49  ;;  %v1344_v49 = vld [vmem:[#allocation11 + $0x20] sm:$0xff] }
  0x53   :  { %518 = vmatpush.bf16.msrb.mxu1 %v1083_v50  ;;  %678 = vmatpush.bf16.msrb.mxu3 %v1337_v21  ;;  %v309_v50 = vld [vmem:[%s1701_s4] sm:$0x3]  ;;  %v1254_v21 = vld [vmem:[#allocation13 + $0x50] sm:$0xf] }
  0x54   :  { %666 = vmatpush.bf16.msrb.mxu2 %v1328_v24  ;;  %v312_v51 = vperm.slane %v309_v50, 1  ;;  %v1256_v24 = vld [vmem:[#allocation13 + $0x58] sm:$0xf0] }
  0x56   :  { %506 = vmatpush.bf16.msrb.mxu0 %v1011_v55 }
  0x57   :  { %519 = vmatpush.bf16.msrb.mxu1 %v1075_v56  ;;  %679 = vmatpush.bf16.msrb.mxu3 %v1336_v23  ;;  %v311_v56 = vperm.slane %v309_v50, 0  ;;  %v1358_v23 = vld [vmem:[#allocation13 + $0x54] sm:$0xf] }
  0x58   :  { %667 = vmatpush.bf16.msrb.mxu2 %v1327_v40  ;;  %v1259_v26 = vor.u32 %v1358_v23, %v1256_v24  ;;  %v1353_v40 = vld [vmem:[#allocation13 + $0x24] sm:$0xf0] }
  0x5a   :  { %507 = vmatpush.bf16.msrb.mxu0 %v1003_v1 }
  0x5b   :  { %520 = vmatpush.bf16.msrb.mxu1 %v1067_v4  ;;  %680 = vmatpush.bf16.msrb.mxu3 %v1335_v25  ;;  %v1255_v25 = vor.u32 %v1359_v22, %v1254_v21 }
  0x5c   :  { %668 = vmatpush.bf16.msrb.mxu2 %v1326_v42  ;;  %v1352_v42 = vld [vmem:[#allocation13 + $0x24] sm:$0xf] }
  0x5e   :  { %508 = vmatpush.bf16.msrb.mxu0 %v995_v13  ;;  %v1272_v13 = vld [vmem:[#allocation13 + $0x78] sm:$0xf0] }
  0x5f   :  { %521 = vmatpush.bf16.msrb.mxu1 %v1059_v16  ;;  %681 = vmatpush.bf16.msrb.mxu3 %v1334_v27  ;;  %v1275_v16 = vor.u32 %v1362_v11, %v1272_v13  ;;  %v1246_v27 = vld [vmem:[#allocation13 + $0x40] sm:$0xf] }
  0x60   :  { %669 = vmatpush.bf16.msrb.mxu2 %v1325_v44 }
  0x62   :  { %759 = vmatpush.bf16.msra.mxu0 %v1347_v46 }
  0x63   :  { %682 = vmatpush.bf16.msrb.mxu3 %v1333_v41  ;;  %876 = vmatpush.bf16.msra.mxu1 %v1271_v12 }
  0x64   :  { %670 = vmatpush.bf16.msrb.mxu2 %v1324_v45  ;;  %v1376_v45 = vld [vmem:[%s1703_s6] ss:$0 sm:$0xff] }
  0x66   :  { %760 = vmatpush.bf16.msra.mxu0 %v1346_v47 }
  0x67   :  { %683 = vmatpush.bf16.msrb.mxu3 %v1332_v43  ;;  %877 = vmatpush.bf16.msra.mxu1 %v1263_v19  ;;  %v1232_v43 = vld [vmem:[#allocation13 + $0x28] sm:$0xf0] }
  0x68   :  { %v1235_v46 = vor.u32 %v1352_v42, %v1232_v43 }
  0x6a   :  { %761 = vmatpush.bf16.msra.mxu0 %v1345_v48 }
  0x6b   :  { %878 = vmatpush.bf16.msra.mxu1 %v1255_v25 }
  0x6e   :  { %762 = vmatpush.bf16.msra.mxu0 %v1344_v49 }
  0x72   :  { %763 = vmatpush.bf16.msra.mxu0 %v1343_v5 }
  0x76   :  { %764 = vmatpush.bf16.msra.mxu0 %v1342_v6 }
  0x7a   :  { %765 = vmatpush.bf16.msra.mxu0 %v1341_v7 }
  0x7e   :  { %766 = vmatpush.bf16.msra.mxu0 %v1340_v8  ;;  %v790_v8 = vld [vmem:[%s1707_s10] sm:$0x3] }
  0x7f   :  { %v792_v9 = vperm.slane %v790_v8, 0  ;;  %v793_v12 = vperm.slane %v790_v8, 1 }
  0xbe   :  { %v256_v30 = vpop.f32.mrf.mxu0 }
  0xbf   :  { %v257_v31 = vadd.f32 %v256_v30, %v163_v28  ;;  %v269_v32 = vpop.f32.mrf.mxu1  ;;  %v1357_v28 = vld [vmem:[#allocation13 + $0x44] sm:$0xf0]  ;;  %v1248_v30 = vld [vmem:[#allocation13 + $0x48] sm:$0xf0] }
  0xc0   :  { %v270_v33 = vadd.f32 %v269_v32, %v164_v29  ;;  %v1356_v29 = vld [vmem:[#allocation13 + $0x44] sm:$0xf] }
  0xc1   :  { %v273_v34 = vmax.f32 %v257_v31, 0.0  ;;  %v1247_v31 = vor.u32 %v1357_v28, %v1246_v27  ;;  %v1251_v32 = vor.u32 %v1356_v29, %v1248_v30 }
  0xc2   :  { %v274_v35 = vmax.f32 %v270_v33, 0.0  ;;  %v1238_v33 = vld [vmem:[#allocation13 + $0x30] sm:$0xf] }
  0xc3   :  { %v275_v36 = vpack.c.bf16 %v273_v34, %v273_v34  ;;  %v1355_v34 = vld [vmem:[#allocation13 + $0x34] sm:$0xf0]  ;;  %879 = vmatpush.bf16.msra.mxu1 %v1247_v31 }
  0xc4   :  { %v276_v37 = vpack.c.bf16 %v274_v35, %v274_v35  ;;  %v1354_v35 = vld [vmem:[#allocation13 + $0x34] sm:$0xf] }
  0xc5   :  { %483 = vmatmul.bf16.vlgmr.msra.gmra.mxu2 %v275_v36  ;;  %509 = vmatmul.bf16.vlgmr.msrb.gmra.mxu0 %v275_v36  ;;  %v1240_v36 = vld [vmem:[#allocation13 + $0x38] sm:$0xf0] }
  0xc6   :  { %496 = vmatmul.bf16.vlgmr.msra.gmra.mxu3 %v276_v37  ;;  %522 = vmatmul.bf16.vlgmr.msrb.gmra.mxu1 %v276_v37  ;;  %v258_v38 = vpop.f32.mrf.mxu0  ;;  %v1239_v37 = vor.u32 %v1355_v34, %v1238_v33 }
  0xc7   :  { %v271_v39 = vpop.f32.mrf.mxu1  ;;  %889 = vmatpush.bf16.msra.mxu2 %v1275_v16  ;;  %v1243_v38 = vor.u32 %v1354_v35, %v1240_v36 }
  0xc8   :  { %v1230_v39 = vld [vmem:[#allocation13 + $0x20] sm:$0xf]  ;;  %880 = vmatpush.bf16.msra.mxu1 %v1239_v37 }
  0xc9   :  { %v1231_v44 = vor.u32 %v1353_v40, %v1230_v39 }
  0xcb   :  { %890 = vmatpush.bf16.msra.mxu2 %v1267_v20 }
  0xcc   :  { %881 = vmatpush.bf16.msra.mxu1 %v1231_v44 }
  0xcf   :  { %891 = vmatpush.bf16.msra.mxu2 %v1259_v26 }
  0xd3   :  { %892 = vmatpush.bf16.msra.mxu2 %v1251_v32 }
  0xd7   :  { %893 = vmatpush.bf16.msra.mxu2 %v1243_v38 }
  0xdb   :  { %894 = vmatpush.bf16.msra.mxu2 %v1235_v46 }
 0x142   :  { %v510_v52 = vpop.f32.mrf.mxu0 }
 0x143   :  { %v511_v53 = vadd.f32 %v510_v52, %v312_v51  ;;  %v523_v54 = vpop.f32.mrf.mxu1 }
 0x145   :  { %v524_v55 = vadd.f32 %v523_v54, %v511_v53  ;;  %v1222_v54 = vld [vmem:[#allocation13 + $0x10] sm:$0xf] }
 0x147   :  { %v528_v57 = vmax.f32 %v524_v55, 0.0  ;;  %v1351_v55 = vld [vmem:[#allocation13 + $0x14] sm:$0xf0] }
 0x148   :  { %v484_v58 = vpop.f32.mrf.mxu2 }
 0x149   :  { %v530_v59 = vpack.c.bf16 %v528_v57, %v528_v57  ;;  %v485_v60 = vadd.f32 %v484_v58, %v311_v56  ;;  %v497_v61 = vpop.f32.mrf.mxu3  ;;  %v1350_v56 = vld [vmem:[#allocation13 + $0x14] sm:$0xf]  ;;  %v1223_v57 = vor.u32 %v1351_v55, %v1222_v54  ;;  %v1224_v58 = vld [vmem:[#allocation13 + $0x18] sm:$0xf0] }
 0x14a   :  { %v512_v62 = vpop.f32.mrf.mxu0 }
 0x14b   :  { %v498_v63 = vadd.f32 %v497_v61, %v485_v60  ;;  %v525_v0 = vpop.f32.mrf.mxu1  ;;  %684 = vmatmul.bf16.vlgmr.msrb.gmra.mxu3 %v530_v59  ;;  %v1227_v59 = vor.u32 %v1350_v56, %v1224_v58  ;;  %882 = vmatpush.bf16.msra.mxu1 %v1223_v57  ;;  %v1214_v60 = vld [vmem:[#allocation13] sm:$0xf]  ;;  %v1349_v61 = vld [vmem:[#allocation13 + $0x4] sm:$0xf0]  ;;  %v1348_v62 = vld [vmem:[#allocation13 + $0x4] sm:$0xf] }
 0x14c   :  { %v1216_v0 = vld [vmem:[#allocation13 + $0x8] sm:$0xf0] }
 0x14d   :  { %v527_v1 = vmax.f32 %v498_v63, 0.0  ;;  %895 = vmatpush.bf16.msra.mxu2 %v1227_v59  ;;  %v1215_v63 = vor.u32 %v1349_v61, %v1214_v60 }
 0x14f   :  { %v529_v2 = vpack.c.bf16 %v527_v1, %v527_v1  ;;  %v1219_v1 = vor.u32 %v1348_v62, %v1216_v0  ;;  %883 = vmatpush.bf16.msra.mxu1 %v1215_v63 }
 0x150   :  { %v486_v3 = vpop.f32.mrf.mxu2 }
 0x151   :  { %v499_v4 = vpop.f32.mrf.mxu3  ;;  %671 = vmatmul.bf16.vlgmr.msrb.gmra.mxu2 %v529_v2  ;;  %v1377_v2 = vld [vmem:[%s1705_s8] ss:$0 sm:$0xff] }
 0x152   :  { %896 = vmatpush.bf16.msra.mxu2 %v1219_v1 }
 0x1ce   :  { %v685_v41 = vpop.f32.mrf.mxu3 }
 0x1d4   :  { %v672_v47 = vpop.f32.mrf.mxu2 }
 0x1d5   :  { %v673_v48 = vadd.f32 %v1376_v45, %v672_v47 }
 0x1d6   :  { %v687_v49 = vpop.f32.mrf.mxu3 }
 0x1d7   :  { %v686_v50 = vadd.f32 %v685_v41, %v673_v48 }
 0x1d9   :  { %v689_v51 = vmax.f32 %v686_v50, 0.0 }
 0x1db   :  { %v690_v52 = vpack.c.bf16 %v689_v51, %v689_v51 }
 0x1dc   :  { %v674_v53 = vpop.f32.mrf.mxu2 }
 0x1dd   :  { %767 = vmatmul.bf16.vlgmr.msra.gmra.mxu0 %v690_v52 }
 0x25a   :  { %v768_v3 = vpop.f32.mrf.mxu0 }
 0x25b   :  { %v769_v4 = vadd.f32 %v1377_v2, %v768_v3 }
 0x25d   :  { %v772_v5 = vmax.f32 %v769_v4, 0.0 }
 0x25f   :  { %v773_v6 = vpack.c.bf16 %v772_v5, %v772_v5 }
 0x261   :  { %884 = vmatmul.bf16.vlgmr.msra.gmra.mxu1 %v773_v6  ;;  %897 = vmatmul.bf16.vlgmr.msra.gmra.mxu2 %v773_v6 }
 0x262   :  { %v770_v7 = vpop.f32.mrf.mxu0 }
 0x2de   :  { %v885_v10 = vpop.f32.mrf.mxu1 }
 0x2df   :  { %v886_v11 = vadd.f32 %v885_v10, %v792_v9 }
 0x2e1   :  { %902 = vst [vmem:[#allocation14] sm:$0xff] %v886_v11 }
 0x2e4   :  { %v898_v13 = vpop.f32.mrf.mxu2 }
 0x2e5   :  { %v899_v14 = vadd.f32 %v898_v13, %v793_v12 }
 0x2e6   :  { %v887_v15 = vpop.f32.mrf.mxu1 }
 0x2e7   :  { %903 = vst [vmem:[#allocation14 + $0x8] sm:$0xff] %v899_v14 }
 0x2e8   :  { %914 = dma.vmem_to_hbm [thread:$0]  %s910_s16, 256, %s912_s18, [#allocation4]  }
 0x2ec   :  { %v900_v16 = vpop.f32.mrf.mxu2 }
 0x2ed   :  { %1578 = dma.done.wait [#allocation4], 256  }
 0x2ee   :  { %1579 = vsyncadd [#allocation4], 4294967040 }
 0x2ef   :  { %919 = vsyncpa [#allocation3], 1 }
 0x2f0   :  { %920 = vsyncpa [#allocation6], 1 }
 0x2f1   :  { %921 = vsyncpa [#allocation9], 1 }
 0x2f2   :  { %922 = vsyncpa [#allocation12], 1 }
 0x2f3   :  { %923 = vsyncpa [#allocation4], 1 }

// kernel: tpu_custom_call.1
= control target key start
LH: loop header
LB: loop body
LE: loop exit
PB: predicated region body
PF: predicated region fallthrough
CT: control target
= control target key end

     0   :  { %16 = vsyncpa [#allocation3], 0  ;;  %s1697_s0 = inlined_call_operand.hbm [shape: bf16[8,128], index: 0, kind: input, shape index: {}]   ;;  %s1698_s1 = inlined_call_operand.hbm [shape: bf16[128,256], index: 1, kind: input, shape index: {}]   ;;  %s1699_s2 = inlined_call_operand.hbm [shape: f32[1,256], index: 2, kind: input, shape index: {}]   ;;  %s1700_s3 = inlined_call_operand.hbm [shape: bf16[256,256], index: 3, kind: input, shape index: {}]   ;;  %s1701_s4 = inlined_call_operand.vmem [shape: f32[1,256], index: 4, kind: input, shape index: {}]   ;;  %s1702_s5 = inlined_call_operand.hbm [shape: bf16[256,128], index: 5, kind: input, shape index: {}]   ;;  %s1703_s6 = inlined_call_operand.vmem [shape: f32[1,128], index: 6, kind: input, shape index: {}]   ;;  %s1704_s7 = inlined_call_operand.hbm [shape: bf16[128,128], index: 7, kind: input, shape index: {}]   ;;  %s1705_s8 = inlined_call_operand.vmem [shape: f32[1,128], index: 8, kind: input, shape index: {}]   ;;  %s1706_s9 = inlined_call_operand.hbm [shape: bf16[128,256], index: 9, kind: input, shape index: {}]   ;;  %s1707_s10 = inlined_call_operand.vmem [shape: f32[1,256], index: 10, kind: input, shape index: {}]   ;;  %s1708_s11 = inlined_call_operand.hbm [shape: f32[8,256], index: 11, kind: output, shape index: {}]  }
   0x1   :  { %17 = vsyncpa [#allocation6], 0 }
   0x2   :  { %18 = vsyncpa [#allocation9], 0 }
   0x3   :  { %19 = vsyncpa [#allocation12], 0  ;;  %s36_s19 = sshll.u32 %s1698_s1, 4  ;;  %s37_s19 = int_to_ptr.hbm [resolvable:$true] %s36_s19 }
   0x4   :  { %20 = vsyncpa [#allocation4], 0  ;;  %s1580_s20 = smov [#allocation5]   ;;  %s60_s24 = sshll.u32 %s1700_s3, 4  ;;  %s61_s24 = int_to_ptr.hbm [resolvable:$true] %s60_s24 }
   0x5   :  { %s38_s21 = sshll.u32 %s1580_s20, 4  ;;  %s1581_s25 = smov 128   ;;  %s39_s21 = int_to_ptr.vmem [resolvable:$true] %s38_s21 }
   0x6   :  { %s1582_s26 = smov 8   ;;  %s1583_s27 = smov [#allocation8]  }
   0x7   :  { %44 = dma.hbm_to_vmem [thread:$0]  %s37_s19, 2048, %s39_s21, [#allocation6], %s1581_s25, %s1581_s25, %s1582_s26  }
   0x8   :  { %s62_s28 = sshll.u32 %s1583_s27, 4  ;;  %s90_s30 = sshll.u32 %s1704_s7, 4  ;;  %s63_s28 = int_to_ptr.vmem [resolvable:$true] %s62_s28  ;;  %s91_s30 = int_to_ptr.hbm [resolvable:$true] %s90_s30 }
   0x9   :  { %68 = dma.hbm_to_vmem [thread:$0]  %s61_s24, 4096, %s63_s28, [#allocation9], %s1581_s25, %s1581_s25, %s1582_s26  }
   0xa   :  { %s1584_s3 = smov [#allocation11]   ;;  %s26_s15 = sshll.u32 %s1697_s0, 4  ;;  %s27_s15 = int_to_ptr.hbm [resolvable:$true] %s26_s15 }
   0xb   :  { %s92_s12 = sshll.u32 %s1584_s3, 4  ;;  %s1585_s16 = smov 64   ;;  %s93_s12 = int_to_ptr.vmem [resolvable:$true] %s92_s12 }
   0xc   :  { %s1586_s17 = smov 4   ;;  %s1587_s18 = smov [#allocation2]  }
   0xd   :  { %98 = dma.hbm_to_vmem [thread:$0]  %s91_s30, 1024, %s93_s12, [#allocation12], %s1585_s16, %s1585_s16, %s1586_s17  }
   0xe   :  { %s28_s19 = sshll.u32 %s1587_s18, 4  ;;  %s50_s22 = sshll.u32 %s1699_s2, 4  ;;  %s29_s19 = int_to_ptr.vmem [resolvable:$true] %s28_s19  ;;  %s51_s22 = int_to_ptr.hbm [resolvable:$true] %s50_s22 }
   0xf   :  { %31 = dma.hbm_to_vmem [thread:$0]  %s27_s15, 64, %s29_s19, [#allocation3]  }
  0x10   :  { %s75_s24 = sshll.u32 %s1702_s5, 4  ;;  %s1588_s27 = smov [#allocation7]   ;;  %s76_s24 = int_to_ptr.hbm [resolvable:$true] %s75_s24 }
  0x11   :  { %s52_s28 = sshll.u32 %s1588_s27, 4  ;;  %s1589_s0 = smov [#allocation10]   ;;  %s53_s28 = int_to_ptr.vmem [resolvable:$true] %s52_s28 }
  0x12   :  { %55 = dma.hbm_to_vmem [thread:$0]  %s51_s22, 32, %s53_s28, [#allocation6]  }
  0x13   :  { %s77_s1 = sshll.u32 %s1589_s0, 4  ;;  %s105_s3 = sshll.u32 %s1706_s9, 4  ;;  %s78_s1 = int_to_ptr.vmem [resolvable:$true] %s77_s1  ;;  %s106_s3 = int_to_ptr.hbm [resolvable:$true] %s105_s3 }
  0x14   :  { %83 = dma.hbm_to_vmem [thread:$0]  %s76_s24, 2048, %s78_s1, [#allocation9], %s1585_s16, %s1585_s16, %s1586_s17  }
  0x15   :  { %s1590_s2 = smov [#allocation13]  }
  0x16   :  { %s107_s12 = sshll.u32 %s1590_s2, 4  ;;  %s108_s12 = int_to_ptr.vmem [resolvable:$true] %s107_s12 }
  0x17   :  { %113 = dma.hbm_to_vmem [thread:$0]  %s106_s3, 2048, %s108_s12, [#allocation12], %s1581_s25, %s1581_s25, %s1582_s26  }
  0x18   :  { %1570 = dma.done.wait [#allocation3], 64  }
  0x19   :  { %1571 = vsyncadd [#allocation3], 4294967232 }
  0x1a   :  { %1572 = dma.done.wait [#allocation6], 2080  }
  0x1b   :  { %1573 = vsyncadd [#allocation6], 4294965216 }
  0x1c   :  { %1574 = dma.done.wait [#allocation9], 6144  }
  0x1d   :  { %1575 = vsyncadd [#allocation9], 4294961152 }
  0x1e   :  { %1576 = dma.done.wait [#allocation12], 3072  }
  0x1f   :  { %1577 = vsyncadd [#allocation12], 4294964224  ;;  %v982_v0 = vld [vmem:[#allocation5 + $0x70] sm:$0xf]  ;;  %v1291_v1 = vld [vmem:[#allocation5 + $0x74] sm:$0xf0] }
  0x20   :  { %v1290_v2 = vld [vmem:[#allocation5 + $0x74] sm:$0xf]  ;;  %v983_v3 = vor.u32 %v1291_v1, %v982_v0  ;;  %v984_v4 = vld [vmem:[#allocation5 + $0x78] sm:$0xf0]  ;;  %v974_v5 = vld [vmem:[#allocation5 + $0x60] sm:$0xf] }
  0x21   :  { %v1289_v6 = vld [vmem:[#allocation5 + $0x64] sm:$0xf0]  ;;  %v987_v7 = vor.u32 %v1290_v2, %v984_v4  ;;  %v1288_v8 = vld [vmem:[#allocation5 + $0x64] sm:$0xf]  ;;  %v976_v9 = vld [vmem:[#allocation5 + $0x68] sm:$0xf0] }
  0x22   :  { %247 = vmatpush.bf16.msra.mxu0 %v983_v3  ;;  %v975_v10 = vor.u32 %v1289_v6, %v974_v5  ;;  %v979_v11 = vor.u32 %v1288_v8, %v976_v9  ;;  %v966_v12 = vld [vmem:[#allocation5 + $0x50] sm:$0xf]  ;;  %v1287_v13 = vld [vmem:[#allocation5 + $0x54] sm:$0xf0]  ;;  %v1286_v14 = vld [vmem:[#allocation5 + $0x54] sm:$0xf] }
  0x23   :  { %260 = vmatpush.bf16.msra.mxu1 %v987_v7  ;;  %v968_v15 = vld [vmem:[#allocation5 + $0x58] sm:$0xf0]  ;;  %v967_v16 = vor.u32 %v1287_v13, %v966_v12  ;;  %v958_v18 = vld [vmem:[#allocation5 + $0x40] sm:$0xf]  ;;  %v1285_v19 = vld [vmem:[#allocation5 + $0x44] sm:$0xf0] }
  0x24   :  { %v971_v17 = vor.u32 %v1286_v14, %v968_v15  ;;  %v1284_v20 = vld [vmem:[#allocation5 + $0x44] sm:$0xf]  ;;  %v960_v21 = vld [vmem:[#allocation5 + $0x48] sm:$0xf0]  ;;  %v959_v22 = vor.u32 %v1285_v19, %v958_v18  ;;  %v1046_v23 = vld [vmem:[#allocation8 + $0x70] sm:$0xf] }
  0x25   :  { %v1307_v24 = vld [vmem:[#allocation8 + $0x74] sm:$0xf0]  ;;  %v1110_v25 = vld [vmem:[#allocation8 + $0xf0] sm:$0xf]  ;;  %v963_v26 = vor.u32 %v1284_v20, %v960_v21  ;;  %v1038_v34 = vld [vmem:[#allocation8 + $0x60] sm:$0xf] }
  0x26   :  { %248 = vmatpush.bf16.msra.mxu0 %v975_v10  ;;  %v950_v27 = vld [vmem:[#allocation5 + $0x30] sm:$0xf]  ;;  %v1283_v28 = vld [vmem:[#allocation5 + $0x34] sm:$0xf0]  ;;  %v1047_v29 = vor.u32 %v1307_v24, %v1046_v23  ;;  %v1282_v31 = vld [vmem:[#allocation5 + $0x34] sm:$0xf] }
  0x27   :  { %261 = vmatpush.bf16.msra.mxu1 %v979_v11  ;;  %v1323_v30 = vld [vmem:[#allocation8 + $0xf4] sm:$0xf0]  ;;  %v1305_v35 = vld [vmem:[#allocation8 + $0x64] sm:$0xf0]  ;;  %v1102_v36 = vld [vmem:[#allocation8 + $0xe0] sm:$0xf]  ;;  %v951_v38 = vor.u32 %v1283_v28, %v950_v27 }
  0x28   :  { %v952_v32 = vld [vmem:[#allocation5 + $0x38] sm:$0xf0]  ;;  %v1111_v33 = vor.u32 %v1323_v30, %v1110_v25  ;;  %475 = vmatpush.bf16.msra.mxu2 %v1047_v29  ;;  %v1321_v37 = vld [vmem:[#allocation8 + $0xe4] sm:$0xf0]  ;;  %v942_v39 = vld [vmem:[#allocation5 + $0x20] sm:$0xf]  ;;  %v1039_v41 = vor.u32 %v1305_v35, %v1038_v34 }
  0x29   :  { %v1281_v40 = vld [vmem:[#allocation5 + $0x24] sm:$0xf0]  ;;  %v1103_v42 = vor.u32 %v1321_v37, %v1102_v36  ;;  %v955_v43 = vor.u32 %v1282_v31, %v952_v32  ;;  %v1280_v44 = vld [vmem:[#allocation5 + $0x24] sm:$0xf]  ;;  %v1030_v45 = vld [vmem:[#allocation8 + $0x50] sm:$0xf] }
  0x2a   :  { %249 = vmatpush.bf16.msra.mxu0 %v967_v16  ;;  %488 = vmatpush.bf16.msra.mxu3 %v1111_v33  ;;  %v1303_v46 = vld [vmem:[#allocation8 + $0x54] sm:$0xf0]  ;;  %v944_v47 = vld [vmem:[#allocation5 + $0x28] sm:$0xf0]  ;;  %v1094_v48 = vld [vmem:[#allocation8 + $0xd0] sm:$0xf]  ;;  %v943_v51 = vor.u32 %v1281_v40, %v942_v39 }
  0x2b   :  { %262 = vmatpush.bf16.msra.mxu1 %v971_v17  ;;  %v1319_v49 = vld [vmem:[#allocation8 + $0xd4] sm:$0xf0]  ;;  %v1031_v50 = vor.u32 %v1303_v46, %v1030_v45  ;;  %v934_v52 = vld [vmem:[#allocation5 + $0x10] sm:$0xf]  ;;  %v1022_v54 = vld [vmem:[#allocation8 + $0x40] sm:$0xf]  ;;  %v947_v56 = vor.u32 %v1280_v44, %v944_v47 }
  0x2c   :  { %476 = vmatpush.bf16.msra.mxu2 %v1039_v41  ;;  %v1095_v53 = vor.u32 %v1319_v49, %v1094_v48  ;;  %v1301_v55 = vld [vmem:[#allocation8 + $0x44] sm:$0xf0]  ;;  %v1279_v57 = vld [vmem:[#allocation5 + $0x14] sm:$0xf0]  ;;  %v1086_v58 = vld [vmem:[#allocation8 + $0xc0] sm:$0xf] }
  0x2d   :  { %v1317_v59 = vld [vmem:[#allocation8 + $0xc4] sm:$0xf0]  ;;  %v1278_v60 = vld [vmem:[#allocation5 + $0x14] sm:$0xf]  ;;  %v936_v61 = vld [vmem:[#allocation5 + $0x18] sm:$0xf0]  ;;  %v1023_v63 = vor.u32 %v1301_v55, %v1022_v54  ;;  %v935_v0 = vor.u32 %v1279_v57, %v934_v52 }
  0x2e   :  { %250 = vmatpush.bf16.msra.mxu0 %v959_v22  ;;  %489 = vmatpush.bf16.msra.mxu3 %v1103_v42  ;;  %v926_v62 = vld [vmem:[#allocation5] sm:$0xf]  ;;  %v1277_v1 = vld [vmem:[#allocation5 + $0x4] sm:$0xf0]  ;;  %v1087_v2 = vor.u32 %v1317_v59, %v1086_v58  ;;  %v1014_v3 = vld [vmem:[#allocation8 + $0x30] sm:$0xf]  ;;  %v939_v5 = vor.u32 %v1278_v60, %v936_v61 }
  0x2f   :  { %263 = vmatpush.bf16.msra.mxu1 %v963_v26  ;;  %v1299_v4 = vld [vmem:[#allocation8 + $0x34] sm:$0xf0]  ;;  %v1276_v6 = vld [vmem:[#allocation5 + $0x4] sm:$0xf]  ;;  %v1078_v7 = vld [vmem:[#allocation8 + $0xb0] sm:$0xf]  ;;  %v927_v16 = vor.u32 %v1277_v1, %v926_v62 }
  0x30   :  { %477 = vmatpush.bf16.msra.mxu2 %v1031_v50  ;;  %v1315_v8 = vld [vmem:[#allocation8 + $0xb4] sm:$0xf0]  ;;  %v928_v9 = vld [vmem:[#allocation5 + $0x8] sm:$0xf0]  ;;  %v1306_v10 = vld [vmem:[#allocation8 + $0x74] sm:$0xf]  ;;  %v1015_v14 = vor.u32 %v1299_v4, %v1014_v3 }
  0x31   :  { %v1048_v11 = vld [vmem:[#allocation8 + $0x78] sm:$0xf0]  ;;  %v1322_v12 = vld [vmem:[#allocation8 + $0xf4] sm:$0xf]  ;;  %v1006_v15 = vld [vmem:[#allocation8 + $0x20] sm:$0xf]  ;;  %v1079_v17 = vor.u32 %v1315_v8, %v1078_v7  ;;  %v931_v19 = vor.u32 %v1276_v6, %v928_v9 }
  0x32   :  { %251 = vmatpush.bf16.msra.mxu0 %v951_v38  ;;  %490 = vmatpush.bf16.msra.mxu3 %v1095_v53  ;;  %v1112_v13 = vld [vmem:[#allocation8 + $0xf8] sm:$0xf0]  ;;  %v1297_v18 = vld [vmem:[#allocation8 + $0x24] sm:$0xf0]  ;;  %v1051_v20 = vor.u32 %v1306_v10, %v1048_v11  ;;  %v1070_v21 = vld [vmem:[#allocation8 + $0xa0] sm:$0xf] }
  0x33   :  { %264 = vmatpush.bf16.msra.mxu1 %v955_v43  ;;  %v1313_v22 = vld [vmem:[#allocation8 + $0xa4] sm:$0xf0]  ;;  %v1115_v23 = vor.u32 %v1322_v12, %v1112_v13  ;;  %v1304_v24 = vld [vmem:[#allocation8 + $0x64] sm:$0xf]  ;;  %v1040_v25 = vld [vmem:[#allocation8 + $0x68] sm:$0xf0]  ;;  %v1007_v28 = vor.u32 %v1297_v18, %v1006_v15 }
  0x34   :  { %478 = vmatpush.bf16.msra.mxu2 %v1023_v63  ;;  %v1320_v26 = vld [vmem:[#allocation8 + $0xe4] sm:$0xf]  ;;  %v1104_v27 = vld [vmem:[#allocation8 + $0xe8] sm:$0xf0]  ;;  %v144_v29 = vld [vmem:[#allocation2] sm:$0xf]  ;;  %v1071_v30 = vor.u32 %v1313_v22, %v1070_v21  ;;  %v1043_v31 = vor.u32 %v1304_v24, %v1040_v25 }
  0x35   :  { %v1107_v32 = vor.u32 %v1320_v26, %v1104_v27  ;;  %v1302_v33 = vld [vmem:[#allocation8 + $0x54] sm:$0xf]  ;;  %v1032_v34 = vld [vmem:[#allocation8 + $0x58] sm:$0xf0]  ;;  %v1300_v39 = vld [vmem:[#allocation8 + $0x44] sm:$0xf] }
  0x36   :  { %252 = vmatpush.bf16.msra.mxu0 %v943_v51  ;;  %491 = vmatpush.bf16.msra.mxu3 %v1087_v2  ;;  %v1318_v35 = vld [vmem:[#allocation8 + $0xd4] sm:$0xf]  ;;  %v1096_v36 = vld [vmem:[#allocation8 + $0xd8] sm:$0xf0]  ;;  %v1035_v37 = vor.u32 %v1302_v33, %v1032_v34  ;;  %v1024_v40 = vld [vmem:[#allocation8 + $0x48] sm:$0xf0] }
  0x37   :  { %265 = vmatpush.bf16.msra.mxu1 %v947_v56  ;;  %v1099_v38 = vor.u32 %v1318_v35, %v1096_v36  ;;  %v1316_v41 = vld [vmem:[#allocation8 + $0xc4] sm:$0xf]  ;;  %v1088_v42 = vld [vmem:[#allocation8 + $0xc8] sm:$0xf0]  ;;  %v1027_v43 = vor.u32 %v1300_v39, %v1024_v40  ;;  %v1298_v45 = vld [vmem:[#allocation8 + $0x34] sm:$0xf] }
  0x38   :  { %479 = vmatpush.bf16.msra.mxu2 %v1015_v14  ;;  %v1091_v44 = vor.u32 %v1316_v41, %v1088_v42  ;;  %v1016_v46 = vld [vmem:[#allocation8 + $0x38] sm:$0xf0]  ;;  %v1314_v47 = vld [vmem:[#allocation8 + $0xb4] sm:$0xf]  ;;  %v1296_v51 = vld [vmem:[#allocation8 + $0x24] sm:$0xf] }
  0x39   :  { %v1080_v48 = vld [vmem:[#allocation8 + $0xb8] sm:$0xf0]  ;;  %v1019_v49 = vor.u32 %v1298_v45, %v1016_v46  ;;  %v1008_v52 = vld [vmem:[#allocation8 + $0x28] sm:$0xf0]  ;;  %v1312_v53 = vld [vmem:[#allocation8 + $0xa4] sm:$0xf] }
  0x3a   :  { %253 = vmatpush.bf16.msra.mxu0 %v935_v0  ;;  %492 = vmatpush.bf16.msra.mxu3 %v1079_v17  ;;  %v1083_v50 = vor.u32 %v1314_v47, %v1080_v48  ;;  %v1072_v54 = vld [vmem:[#allocation8 + $0xa8] sm:$0xf0]  ;;  %v1011_v55 = vor.u32 %v1296_v51, %v1008_v52  ;;  %v998_v57 = vld [vmem:[#allocation8 + $0x10] sm:$0xf]  ;;  %v1295_v58 = vld [vmem:[#allocation8 + $0x14] sm:$0xf0] }
  0x3b   :  { %266 = vmatpush.bf16.msra.mxu1 %v939_v5  ;;  %v1075_v56 = vor.u32 %v1312_v53, %v1072_v54  ;;  %v1062_v59 = vld [vmem:[#allocation8 + $0x90] sm:$0xf]  ;;  %v999_v60 = vor.u32 %v1295_v58, %v998_v57  ;;  %v1311_v61 = vld [vmem:[#allocation8 + $0x94] sm:$0xf0]  ;;  %v1294_v62 = vld [vmem:[#allocation8 + $0x14] sm:$0xf] }
  0x3c   :  { %480 = vmatpush.bf16.msra.mxu2 %v1007_v28  ;;  %v1000_v63 = vld [vmem:[#allocation8 + $0x18] sm:$0xf0]  ;;  %v1063_v0 = vor.u32 %v1311_v61, %v1062_v59  ;;  %v1310_v2 = vld [vmem:[#allocation8 + $0x94] sm:$0xf]  ;;  %v990_v5 = vld [vmem:[#allocation8] sm:$0xf] }
  0x3d   :  { %v1003_v1 = vor.u32 %v1294_v62, %v1000_v63  ;;  %v1064_v3 = vld [vmem:[#allocation8 + $0x98] sm:$0xf0]  ;;  %v1293_v6 = vld [vmem:[#allocation8 + $0x4] sm:$0xf0]  ;;  %v1054_v7 = vld [vmem:[#allocation8 + $0x80] sm:$0xf] }
  0x3e   :  { %254 = vmatpush.bf16.msra.mxu0 %v927_v16  ;;  %493 = vmatpush.bf16.msra.mxu3 %v1071_v30  ;;  %v1067_v4 = vor.u32 %v1310_v2, %v1064_v3  ;;  %v991_v8 = vor.u32 %v1293_v6, %v990_v5  ;;  %v1309_v9 = vld [vmem:[#allocation8 + $0x84] sm:$0xf0]  ;;  %v1292_v10 = vld [vmem:[#allocation8 + $0x4] sm:$0xf]  ;;  %v992_v11 = vld [vmem:[#allocation8 + $0x8] sm:$0xf0] }
  0x3f   :  { %267 = vmatpush.bf16.msra.mxu1 %v931_v19  ;;  %v1055_v12 = vor.u32 %v1309_v9, %v1054_v7  ;;  %v995_v13 = vor.u32 %v1292_v10, %v992_v11  ;;  %v1308_v14 = vld [vmem:[#allocation8 + $0x84] sm:$0xf]  ;;  %v1056_v15 = vld [vmem:[#allocation8 + $0x88] sm:$0xf0]  ;;  %v1339_v17 = vld [vmem:[#allocation10 + $0x78] sm:$0xff]  ;;  %s1591_s15 = smov [#allocation14]  }
  0x40   :  { %481 = vmatpush.bf16.msra.mxu2 %v999_v60  ;;  %v1059_v16 = vor.u32 %v1308_v14, %v1056_v15  ;;  %v1331_v18 = vld [vmem:[#allocation10 + $0x38] sm:$0xff]  ;;  %v1338_v19 = vld [vmem:[#allocation10 + $0x70] sm:$0xff]  ;;  %v1337_v21 = vld [vmem:[#allocation10 + $0x68] sm:$0xff]  ;;  %s909_s16 = sshll.u32 %s1591_s15, 4  ;;  %s911_s18 = sshll.u32 %s1708_s11, 4  ;;  %s910_s16 = int_to_ptr.vmem [resolvable:$true] %s909_s16  ;;  %s912_s18 = int_to_ptr.hbm [resolvable:$true] %s911_s18 }
  0x41   :  { %255 = vmatmul.bf16.vlgmr.msra.gmra.mxu0 %v144_v29  ;;  %v1329_v22 = vld [vmem:[#allocation10 + $0x28] sm:$0xff]  ;;  %v1328_v24 = vld [vmem:[#allocation10 + $0x20] sm:$0xff]  ;;  %v1335_v25 = vld [vmem:[#allocation10 + $0x58] sm:$0xff] }
  0x42   :  { %501 = vmatpush.bf16.msrb.mxu0 %v1051_v20  ;;  %268 = vmatmul.bf16.vlgmr.msra.gmra.mxu1 %v144_v29  ;;  %v1330_v20 = vld [vmem:[#allocation10 + $0x30] sm:$0xff]  ;;  %v161_v26 = vld [vmem:[#allocation7] sm:$0x3]  ;;  %v1333_v41 = vld [vmem:[#allocation10 + $0x48] sm:$0xff] }
  0x43   :  { %514 = vmatpush.bf16.msrb.mxu1 %v1115_v23  ;;  %494 = vmatpush.bf16.msra.mxu3 %v1063_v0  ;;  %v1336_v23 = vld [vmem:[#allocation10 + $0x60] sm:$0xff]  ;;  %v1334_v27 = vld [vmem:[#allocation10 + $0x50] sm:$0xff]  ;;  %v163_v28 = vperm.slane %v161_v26, 0  ;;  %v164_v29 = vperm.slane %v161_v26, 1  ;;  %v1327_v40 = vld [vmem:[#allocation10 + $0x18] sm:$0xff] }
  0x44   :  { %482 = vmatpush.bf16.msra.mxu2 %v991_v8  ;;  %v1326_v42 = vld [vmem:[#allocation10 + $0x10] sm:$0xff]  ;;  %v1324_v45 = vld [vmem:[#allocation10] sm:$0xff]  ;;  %v1347_v46 = vld [vmem:[#allocation11 + $0x38] sm:$0xff] }
  0x45   :  { %v1346_v47 = vld [vmem:[#allocation11 + $0x30] sm:$0xff]  ;;  %v1345_v48 = vld [vmem:[#allocation11 + $0x28] sm:$0xff]  ;;  %v1343_v5 = vld [vmem:[#allocation11 + $0x18] sm:$0xff] }
  0x46   :  { %502 = vmatpush.bf16.msrb.mxu0 %v1043_v31  ;;  %v1342_v6 = vld [vmem:[#allocation11 + $0x10] sm:$0xff]  ;;  %v1341_v7 = vld [vmem:[#allocation11 + $0x8] sm:$0xff]  ;;  %v1340_v8 = vld [vmem:[#allocation11] sm:$0xff] }
  0x47   :  { %515 = vmatpush.bf16.msrb.mxu1 %v1107_v32  ;;  %495 = vmatpush.bf16.msra.mxu3 %v1055_v12  ;;  %v1270_v9 = vld [vmem:[#allocation13 + $0x70] sm:$0xf]  ;;  %v1363_v10 = vld [vmem:[#allocation13 + $0x74] sm:$0xf0]  ;;  %v1362_v11 = vld [vmem:[#allocation13 + $0x74] sm:$0xf] }
  0x48   :  { %663 = vmatpush.bf16.msrb.mxu2 %v1331_v18  ;;  %v1271_v12 = vor.u32 %v1363_v10, %v1270_v9  ;;  %v1262_v14 = vld [vmem:[#allocation13 + $0x60] sm:$0xf]  ;;  %v1361_v15 = vld [vmem:[#allocation13 + $0x64] sm:$0xf0]  ;;  %v1264_v18 = vld [vmem:[#allocation13 + $0x68] sm:$0xf0] }
  0x4a   :  { %503 = vmatpush.bf16.msrb.mxu0 %v1035_v37 }
  0x4b   :  { %516 = vmatpush.bf16.msrb.mxu1 %v1099_v38  ;;  %676 = vmatpush.bf16.msrb.mxu3 %v1339_v17  ;;  %v1360_v17 = vld [vmem:[#allocation13 + $0x64] sm:$0xf] }
  0x4c   :  { %664 = vmatpush.bf16.msrb.mxu2 %v1330_v20  ;;  %v1267_v20 = vor.u32 %v1360_v17, %v1264_v18 }
  0x4e   :  { %504 = vmatpush.bf16.msrb.mxu0 %v1027_v43  ;;  %v1332_v43 = vld [vmem:[#allocation10 + $0x40] sm:$0xff] }
  0x4f   :  { %517 = vmatpush.bf16.msrb.mxu1 %v1091_v44  ;;  %677 = vmatpush.bf16.msrb.mxu3 %v1338_v19  ;;  %v1325_v44 = vld [vmem:[#allocation10 + $0x8] sm:$0xff]  ;;  %v1263_v19 = vor.u32 %v1361_v15, %v1262_v14 }
  0x50   :  { %665 = vmatpush.bf16.msrb.mxu2 %v1329_v22  ;;  %v1359_v22 = vld [vmem:[#allocation13 + $0x54] sm:$0xf0] }
  0x52   :  { %505 = vmatpush.bf16.msrb.mxu0 %v1019_v49  ;;  %v1344_v49 = vld [vmem:[#allocation11 + $0x20] sm:$0xff] }
  0x53   :  { %518 = vmatpush.bf16.msrb.mxu1 %v1083_v50  ;;  %678 = vmatpush.bf16.msrb.mxu3 %v1337_v21  ;;  %v309_v50 = vld [vmem:[%s1701_s4] sm:$0x3]  ;;  %v1254_v21 = vld [vmem:[#allocation13 + $0x50] sm:$0xf] }
  0x54   :  { %666 = vmatpush.bf16.msrb.mxu2 %v1328_v24  ;;  %v312_v51 = vperm.slane %v309_v50, 1  ;;  %v1256_v24 = vld [vmem:[#allocation13 + $0x58] sm:$0xf0] }
  0x56   :  { %506 = vmatpush.bf16.msrb.mxu0 %v1011_v55 }
  0x57   :  { %519 = vmatpush.bf16.msrb.mxu1 %v1075_v56  ;;  %679 = vmatpush.bf16.msrb.mxu3 %v1336_v23  ;;  %v311_v56 = vperm.slane %v309_v50, 0  ;;  %v1358_v23 = vld [vmem:[#allocation13 + $0x54] sm:$0xf] }
  0x58   :  { %667 = vmatpush.bf16.msrb.mxu2 %v1327_v40  ;;  %v1259_v26 = vor.u32 %v1358_v23, %v1256_v24  ;;  %v1353_v40 = vld [vmem:[#allocation13 + $0x24] sm:$0xf0] }
  0x5a   :  { %507 = vmatpush.bf16.msrb.mxu0 %v1003_v1 }
  0x5b   :  { %520 = vmatpush.bf16.msrb.mxu1 %v1067_v4  ;;  %680 = vmatpush.bf16.msrb.mxu3 %v1335_v25  ;;  %v1255_v25 = vor.u32 %v1359_v22, %v1254_v21 }
  0x5c   :  { %668 = vmatpush.bf16.msrb.mxu2 %v1326_v42  ;;  %v1352_v42 = vld [vmem:[#allocation13 + $0x24] sm:$0xf] }
  0x5e   :  { %508 = vmatpush.bf16.msrb.mxu0 %v995_v13  ;;  %v1272_v13 = vld [vmem:[#allocation13 + $0x78] sm:$0xf0] }
  0x5f   :  { %521 = vmatpush.bf16.msrb.mxu1 %v1059_v16  ;;  %681 = vmatpush.bf16.msrb.mxu3 %v1334_v27  ;;  %v1275_v16 = vor.u32 %v1362_v11, %v1272_v13  ;;  %v1246_v27 = vld [vmem:[#allocation13 + $0x40] sm:$0xf] }
  0x60   :  { %669 = vmatpush.bf16.msrb.mxu2 %v1325_v44 }
  0x62   :  { %759 = vmatpush.bf16.msra.mxu0 %v1347_v46 }
  0x63   :  { %682 = vmatpush.bf16.msrb.mxu3 %v1333_v41  ;;  %876 = vmatpush.bf16.msra.mxu1 %v1271_v12 }
  0x64   :  { %670 = vmatpush.bf16.msrb.mxu2 %v1324_v45  ;;  %v1376_v45 = vld [vmem:[%s1703_s6] ss:$0 sm:$0xff] }
  0x66   :  { %760 = vmatpush.bf16.msra.mxu0 %v1346_v47 }
  0x67   :  { %683 = vmatpush.bf16.msrb.mxu3 %v1332_v43  ;;  %877 = vmatpush.bf16.msra.mxu1 %v1263_v19  ;;  %v1232_v43 = vld [vmem:[#allocation13 + $0x28] sm:$0xf0] }
  0x68   :  { %v1235_v46 = vor.u32 %v1352_v42, %v1232_v43 }
  0x6a   :  { %761 = vmatpush.bf16.msra.mxu0 %v1345_v48 }
  0x6b   :  { %878 = vmatpush.bf16.msra.mxu1 %v1255_v25 }
  0x6e   :  { %762 = vmatpush.bf16.msra.mxu0 %v1344_v49 }
  0x72   :  { %763 = vmatpush.bf16.msra.mxu0 %v1343_v5 }
  0x76   :  { %764 = vmatpush.bf16.msra.mxu0 %v1342_v6 }
  0x7a   :  { %765 = vmatpush.bf16.msra.mxu0 %v1341_v7 }
  0x7e   :  { %766 = vmatpush.bf16.msra.mxu0 %v1340_v8  ;;  %v790_v8 = vld [vmem:[%s1707_s10] sm:$0x3] }
  0x7f   :  { %v792_v9 = vperm.slane %v790_v8, 0  ;;  %v793_v12 = vperm.slane %v790_v8, 1 }
  0xbe   :  { %v256_v30 = vpop.f32.mrf.mxu0 }
  0xbf   :  { %v257_v31 = vadd.f32 %v256_v30, %v163_v28  ;;  %v269_v32 = vpop.f32.mrf.mxu1  ;;  %v1357_v28 = vld [vmem:[#allocation13 + $0x44] sm:$0xf0]  ;;  %v1248_v30 = vld [vmem:[#allocation13 + $0x48] sm:$0xf0] }
  0xc0   :  { %v270_v33 = vadd.f32 %v269_v32, %v164_v29  ;;  %v1356_v29 = vld [vmem:[#allocation13 + $0x44] sm:$0xf] }
  0xc1   :  { %v273_v34 = vmax.f32 %v257_v31, 0.0  ;;  %v1247_v31 = vor.u32 %v1357_v28, %v1246_v27  ;;  %v1251_v32 = vor.u32 %v1356_v29, %v1248_v30 }
  0xc2   :  { %v274_v35 = vmax.f32 %v270_v33, 0.0  ;;  %v1238_v33 = vld [vmem:[#allocation13 + $0x30] sm:$0xf] }
  0xc3   :  { %v275_v36 = vpack.c.bf16 %v273_v34, %v273_v34  ;;  %v1355_v34 = vld [vmem:[#allocation13 + $0x34] sm:$0xf0]  ;;  %879 = vmatpush.bf16.msra.mxu1 %v1247_v31 }
  0xc4   :  { %v276_v37 = vpack.c.bf16 %v274_v35, %v274_v35  ;;  %v1354_v35 = vld [vmem:[#allocation13 + $0x34] sm:$0xf] }
  0xc5   :  { %483 = vmatmul.bf16.vlgmr.msra.gmra.mxu2 %v275_v36  ;;  %509 = vmatmul.bf16.vlgmr.msrb.gmra.mxu0 %v275_v36  ;;  %v1240_v36 = vld [vmem:[#allocation13 + $0x38] sm:$0xf0] }
  0xc6   :  { %496 = vmatmul.bf16.vlgmr.msra.gmra.mxu3 %v276_v37  ;;  %522 = vmatmul.bf16.vlgmr.msrb.gmra.mxu1 %v276_v37  ;;  %v258_v38 = vpop.f32.mrf.mxu0  ;;  %v1239_v37 = vor.u32 %v1355_v34, %v1238_v33 }
  0xc7   :  { %v271_v39 = vpop.f32.mrf.mxu1  ;;  %889 = vmatpush.bf16.msra.mxu2 %v1275_v16  ;;  %v1243_v38 = vor.u32 %v1354_v35, %v1240_v36 }
  0xc8   :  { %v1230_v39 = vld [vmem:[#allocation13 + $0x20] sm:$0xf]  ;;  %880 = vmatpush.bf16.msra.mxu1 %v1239_v37 }
  0xc9   :  { %v1231_v44 = vor.u32 %v1353_v40, %v1230_v39 }
  0xcb   :  { %890 = vmatpush.bf16.msra.mxu2 %v1267_v20 }
  0xcc   :  { %881 = vmatpush.bf16.msra.mxu1 %v1231_v44 }
  0xcf   :  { %891 = vmatpush.bf16.msra.mxu2 %v1259_v26 }
  0xd3   :  { %892 = vmatpush.bf16.msra.mxu2 %v1251_v32 }
  0xd7   :  { %893 = vmatpush.bf16.msra.mxu2 %v1243_v38 }
  0xdb   :  { %894 = vmatpush.bf16.msra.mxu2 %v1235_v46 }
 0x142   :  { %v510_v52 = vpop.f32.mrf.mxu0 }
 0x143   :  { %v511_v53 = vadd.f32 %v510_v52, %v312_v51  ;;  %v523_v54 = vpop.f32.mrf.mxu1 }
 0x145   :  { %v524_v55 = vadd.f32 %v523_v54, %v511_v53  ;;  %v1222_v54 = vld [vmem:[#allocation13 + $0x10] sm:$0xf] }
 0x147   :  { %v528_v57 = vmax.f32 %v524_v55, 0.0  ;;  %v1351_v55 = vld [vmem:[#allocation13 + $0x14] sm:$0xf0] }
 0x148   :  { %v484_v58 = vpop.f32.mrf.mxu2 }
 0x149   :  { %v530_v59 = vpack.c.bf16 %v528_v57, %v528_v57  ;;  %v485_v60 = vadd.f32 %v484_v58, %v311_v56  ;;  %v497_v61 = vpop.f32.mrf.mxu3  ;;  %v1350_v56 = vld [vmem:[#allocation13 + $0x14] sm:$0xf]  ;;  %v1223_v57 = vor.u32 %v1351_v55, %v1222_v54  ;;  %v1224_v58 = vld [vmem:[#allocation13 + $0x18] sm:$0xf0] }
 0x14a   :  { %v512_v62 = vpop.f32.mrf.mxu0 }
 0x14b   :  { %v498_v63 = vadd.f32 %v497_v61, %v485_v60  ;;  %v525_v0 = vpop.f32.mrf.mxu1  ;;  %684 = vmatmul.bf16.vlgmr.msrb.gmra.mxu3 %v530_v59  ;;  %v1227_v59 = vor.u32 %v1350_v56, %v1224_v58  ;;  %882 = vmatpush.bf16.msra.mxu1 %v1223_v57  ;;  %v1214_v60 = vld [vmem:[#allocation13] sm:$0xf]  ;;  %v1349_v61 = vld [vmem:[#allocation13 + $0x4] sm:$0xf0]  ;;  %v1348_v62 = vld [vmem:[#allocation13 + $0x4] sm:$0xf] }
 0x14c   :  { %v1216_v0 = vld [vmem:[#allocation13 + $0x8] sm:$0xf0] }
 0x14d   :  { %v527_v1 = vmax.f32 %v498_v63, 0.0  ;;  %895 = vmatpush.bf16.msra.mxu2 %v1227_v59  ;;  %v1215_v63 = vor.u32 %v1349_v61, %v1214_v60 }
 0x14f   :  { %v529_v2 = vpack.c.bf16 %v527_v1, %v527_v1  ;;  %v1219_v1 = vor.u32 %v1348_v62, %v1216_v0  ;;  %883 = vmatpush.bf16.msra.mxu1 %v1215_v63 }
 0x150   :  { %v486_v3 = vpop.f32.mrf.mxu2 }
 0x151   :  { %v499_v4 = vpop.f32.mrf.mxu3  ;;  %671 = vmatmul.bf16.vlgmr.msrb.gmra.mxu2 %v529_v2  ;;  %v1377_v2 = vld [vmem:[%s1705_s8] ss:$0 sm:$0xff] }
 0x152   :  { %896 = vmatpush.bf16.msra.mxu2 %v1219_v1 }
 0x1ce   :  { %v685_v41 = vpop.f32.mrf.mxu3 }
 0x1d4   :  { %v672_v47 = vpop.f32.mrf.mxu2 }
 0x1d5   :  { %v673_v48 = vadd.f32 %v1376_v45, %v672_v47 }
 0x1d6   :  { %v687_v49 = vpop.f32.mrf.mxu3 }
 0x1d7   :  { %v686_v50 = vadd.f32 %v685_v41, %v673_v48 }
 0x1d9   :  { %v689_v51 = vmax.f32 %v686_v50, 0.0 }
 0x1db   :  { %v690_v52 = vpack.c.bf16 %v689_v51, %v689_v51 }
 0x1dc   :  { %v674_v53 = vpop.f32.mrf.mxu2 }
 0x1dd   :  { %767 = vmatmul.bf16.vlgmr.msra.gmra.mxu0 %v690_v52 }
 0x25a   :  { %v768_v3 = vpop.f32.mrf.mxu0 }
 0x25b   :  { %v769_v4 = vadd.f32 %v1377_v2, %v768_v3 }
 0x25d   :  { %v772_v5 = vmax.f32 %v769_v4, 0.0 }
 0x25f   :  { %v773_v6 = vpack.c.bf16 %v772_v5, %v772_v5 }
 0x261   :  { %884 = vmatmul.bf16.vlgmr.msra.gmra.mxu1 %v773_v6  ;;  %897 = vmatmul.bf16.vlgmr.msra.gmra.mxu2 %v773_v6 }
 0x262   :  { %v770_v7 = vpop.f32.mrf.mxu0 }
 0x2de   :  { %v885_v10 = vpop.f32.mrf.mxu1 }
 0x2df   :  { %v886_v11 = vadd.f32 %v885_v10, %v792_v9 }
 0x2e1   :  { %902 = vst [vmem:[#allocation14] sm:$0xff] %v886_v11 }
 0x2e4   :  { %v898_v13 = vpop.f32.mrf.mxu2 }
 0x2e5   :  { %v899_v14 = vadd.f32 %v898_v13, %v793_v12 }
 0x2e6   :  { %v887_v15 = vpop.f32.mrf.mxu1 }
 0x2e7   :  { %903 = vst [vmem:[#allocation14 + $0x8] sm:$0xff] %v899_v14 }
 0x2e8   :  { %914 = dma.vmem_to_hbm [thread:$0]  %s910_s16, 256, %s912_s18, [#allocation4]  }
 0x2ec   :  { %v900_v16 = vpop.f32.mrf.mxu2 }
 0x2ed   :  { %1578 = dma.done.wait [#allocation4], 256  }
 0x2ee   :  { %1579 = vsyncadd [#allocation4], 4294967040 }
 0x2ef   :  { %919 = vsyncpa [#allocation3], 1 }
 0x2f0   :  { %920 = vsyncpa [#allocation6], 1 }
 0x2f1   :  { %921 = vsyncpa [#allocation9], 1 }
 0x2f2   :  { %922 = vsyncpa [#allocation12], 1 }
 0x2f3   :  { %923 = vsyncpa [#allocation4], 1 }

</bundles_post_ra>
